<compile_context>
chip_gen: v7x
topology: tpu7x:2x2x1
jax: 0.10.0
libtpu: 0.0.40
codegen_flags: <defaults>
</compile_context>

<pallas_src>
import jax
import jax.numpy as jnp
from jax.experimental import pallas as pl
from jax.experimental.pallas import tpu as pltpu

LANE = 128  # TPU lane width; also used as the node-row padding so the
            # adjacency's source (lane) dim is 128-aligned.


def _ru(x, m):
    return ((x + m - 1) // m) * m


def _pad2d(a, rows, cols):
    """Zero-pad a 2-D f32 array to [rows, cols]."""
    a = jnp.asarray(a, jnp.float32)
    r, c = a.shape
    return jnp.zeros((rows, cols), jnp.float32).at[:r, :c].set(a)


# ----------------------------------------------------------------------------
# Fused forward kernel (closure over static graph metadata + operand indices)
# ----------------------------------------------------------------------------

def _make_fused_kernel(node_types, edge_types, num_layers, num_runs,
                       eps_tbl, out_node, n_pad, w_idx, b_idx):
    def kernel(*refs):
        out_ref = refs[-1]
        it = iter(refs[:-1])
        # unpack refs in exactly the order the wrapper packed them
        x = {nt: next(it) for nt in node_types}
        keep = {nt: next(it) for nt in node_types}
        adj = {et: next(it) for et in edge_types}
        w_ref = next(it)   # [num_w, 128, 128] bf16
        b_ref = next(it)   # [num_b,   1, 128] f32

        def W(i):
            return w_ref[i]            # [128, 128] bf16 (static index)

        def B(i):
            return b_ref[i]            # [1, 128] f32 (static index)

        # Hoist adjacency loads: reused by every layer, Pallas won't CSE them.
        adj_v = {et: adj[et][...] for et in edge_types}

        # 1) input projection (one matmul per node type) + DropGNN dropout,
        #    runs stacked along rows: h[nt] is [num_runs * N_pad, 128] f32.
        h = {}
        for nt in node_types:
            base = jnp.dot(x[nt][...], W(w_idx[("lin", nt)]),
                           preferred_element_type=jnp.float32) + B(b_idx[("lin", nt)])
            stacked = jnp.concatenate([base] * num_runs, axis=0)
            h[nt] = stacked * keep[nt][...]

        # 2) GIN message-passing layers: 3 matmuls per (layer, edge type).
        #    Edge indices only address the run-0 block of the flattened node
        #    tensors (exactly like the PyTorch .view(-1, H) forward), so only
        #    the first N_pad rows receive aggregated messages.
        for li in range(num_layers):
            new = {}
            for ei, et in enumerate(edge_types):
                src, _, dst = et
                nd = n_pad[dst]
                ns = n_pad[src]
                eps = eps_tbl[li][ei]
                agg = jnp.dot(adj_v[et], h[src][:ns].astype(jnp.bfloat16),
                              preferred_element_type=jnp.float32)
                z = h[dst]
                if eps != 0.0:         # trace-time guard; eps init is 0.0
                    z = (1.0 + eps) * z
                if num_runs == 1:
                    z = z + agg
                else:
                    z = jnp.concatenate([z[:nd] + agg, z[nd:]], axis=0)
                h1 = jnp.dot(z.astype(jnp.bfloat16), W(w_idx[("w1", li, et)]),
                             preferred_element_type=jnp.float32) + B(b_idx[("b1", li, et)])
                h1 = jnp.maximum(h1, 0.0)          # BN already folded into W1/b1
                o = jnp.dot(h1.astype(jnp.bfloat16), W(w_idx[("w2", li, et)]),
                            preferred_element_type=jnp.float32) + B(b_idx[("b2", li, et)])
                # NOTE: later edge types with the same dst OVERWRITE earlier
                # ones (no summation) -- mirrors the PyTorch forward exactly.
                new[dst] = jnp.maximum(o, 0.0)     # outer F.relu fused
            for nt in node_types:
                h[nt] = new[nt] if nt in new else jnp.maximum(h[nt], 0.0)

        # 3) mean over runs (1/num_runs folded into the final weight) + final
        #    linear -> lane-dense padded output.
        nd = n_pad[out_node]
        ho = h[out_node]
        hm = ho[:nd]
        for r in range(1, num_runs):
            hm = hm + ho[r * nd:(r + 1) * nd]
        out_ref[...] = jnp.dot(hm.astype(jnp.bfloat16), W(w_idx[("final",)]),
                               preferred_element_type=jnp.float32) + B(b_idx[("final",)])

    return kernel


# ----------------------------------------------------------------------------
# Parameter init (BN folding, transposition, lane padding done at prep time)
# ----------------------------------------------------------------------------

def init_params(key, node_types, edge_types, in_channels_dict, hidden,
                num_layers, num_classes, bn_eps=1e-5):
    h_pad = _ru(hidden, LANE)
    c_pad = _ru(num_classes, LANE)
    params = {"lins": {}, "layers": [], "final": {}}

    for nt in node_types:
        cin = in_channels_dict[nt]
        cin_pad = _ru(cin, LANE)
        key, k1, k2 = jax.random.split(key, 3)
        # TODO(synk): in_channels == 0 (nn.Embedding path with dynamic
        # re-init) not modeled; all node types here use the Linear branch.
        w = jax.random.normal(k1, (hidden, cin), jnp.float32) * (1.0 / jnp.sqrt(cin))
        b = jax.random.normal(k2, (hidden,), jnp.float32) * 0.01
        params["lins"][nt] = {
            "wt": _pad2d(w.T, cin_pad, h_pad).astype(jnp.bfloat16),  # [Cin_p, H_p]
            "b": _pad2d(b.reshape(1, hidden), 1, h_pad),             # [1, H_p] f32
        }

    for _ in range(num_layers):
        layer = {}
        for et in edge_types:
            key, k1, k2, k3, k4 = jax.random.split(key, 5)
            w1 = jax.random.normal(k1, (hidden, hidden), jnp.float32) * (1.0 / jnp.sqrt(hidden))
            b1 = jax.random.normal(k2, (hidden,), jnp.float32) * 0.01
            w2 = jax.random.normal(k3, (hidden, hidden), jnp.float32) * (1.0 / jnp.sqrt(hidden))
            b2 = jax.random.normal(k4, (hidden,), jnp.float32) * 0.01
            # BatchNorm1d default init / running stats, folded into Linear1.
            # TODO(synk): train-mode BatchNorm batch statistics not reproduced;
            # eval-mode running stats are folded in here.
            gamma = jnp.ones((hidden,), jnp.float32)
            beta = jnp.zeros((hidden,), jnp.float32)
            mean = jnp.zeros((hidden,), jnp.float32)
            var = jnp.ones((hidden,), jnp.float32)
            scale = gamma * jax.lax.rsqrt(var + bn_eps)
            w1f = w1.T * scale[None, :]
            b1f = (b1 - mean) * scale + beta
            layer[et] = {
                "w1t": _pad2d(w1f, h_pad, h_pad).astype(jnp.bfloat16),
                "b1": _pad2d(b1f.reshape(1, hidden), 1, h_pad),
                "w2t": _pad2d(w2.T, h_pad, h_pad).astype(jnp.bfloat16),
                "b2": _pad2d(b2.reshape(1, hidden), 1, h_pad),
                "eps": 0.0,   # GINConv(train_eps=True) initializes eps to 0
            }
        params["layers"].append(layer)

    key, k1, k2 = jax.random.split(key, 3)
    wf = jax.random.normal(k1, (num_classes, hidden), jnp.float32) * (1.0 / jnp.sqrt(hidden))
    bf = jax.random.normal(k2, (num_classes,), jnp.float32) * 0.01
    params["final"] = {
        "wt": _pad2d(wf.T, h_pad, c_pad).astype(jnp.bfloat16),
        "b": _pad2d(bf.reshape(1, num_classes), 1, c_pad),
    }
    return params


# ----------------------------------------------------------------------------
# Forward wrapper: packs operands, builds adjacency once, calls ONE kernel
# ----------------------------------------------------------------------------

def drop_hetero_gin_forward(params, x_dict, edge_index_dict, node_types,
                            hidden, num_classes, num_layers, p, num_runs,
                            drop_key, out_node="author"):
    edge_types = list(edge_index_dict.keys())
    h_pad = _ru(hidden, LANE)
    c_pad = _ru(num_classes, LANE)

    n_nodes = {nt: x_dict[nt].shape[0] for nt in node_types}
    # 128-aligned node rows: adjacency lane dim is then unmasked/128-aligned.
    n_pad = {nt: _ru(n_nodes[nt], LANE) for nt in node_types}

    # zero-pad node features to [N_pad, Cin_pad] and cast to bf16 (lane-dense)
    x_pad = {}
    for nt in node_types:
        cin_pad = params["lins"][nt]["wt"].shape[0]
        x_pad[nt] = _pad2d(x_dict[nt], n_pad[nt], cin_pad).astype(jnp.bfloat16)

    # DropGNN per-(run, node) keep/scale mask drawn host-side (the in-kernel
    # hardware PRNG has no interpret-mode lowering); lane-broadcast so the
    # in-kernel multiply is a plain elementwise op, padded rows zeroed.
    inv_keep = 1.0 / (1.0 - p)
    keep = {}
    for k, nt in zip(jax.random.split(drop_key, len(node_types)), node_types):
        kr = jax.random.bernoulli(k, 1.0 - p, (num_runs, n_nodes[nt]))
        scale = jnp.where(kr, inv_keep, 0.0).astype(jnp.float32)           # [R, N]
        sc_pad = jnp.zeros((num_runs, n_pad[nt]), jnp.float32)
        sc_pad = sc_pad.at[:, :n_nodes[nt]].set(scale)                     # [R, N_pad]
        keep[nt] = jnp.broadcast_to(
            sc_pad.reshape(num_runs * n_pad[nt], 1),
            (num_runs * n_pad[nt], h_pad)).astype(jnp.float32)

    # dense adjacency per edge type, built ONCE: A[d, s] = edge multiplicity.
    # Only the run-0 [Nd, Ns] block of the flattened tensors ever receives
    # messages, so that is all we build (bf16 is exact for small counts).
    adjs = {}
    for et in edge_types:
        src, _, dst = et
        ei = edge_index_dict[et]
        a = jnp.zeros((n_pad[dst], n_pad[src]), jnp.float32)
        a = a.at[ei[1], ei[0]].add(1.0)
        adjs[et] = a.astype(jnp.bfloat16)

    # Pack all [128,128] bf16 weights / [1,128] f32 biases into two stacked
    # operands; the kernel unpacks them with static ref[i] indexing.
    # TODO(synk): weight stacking assumes every padded weight is [LANE, LANE]
    # (true while in_channels, hidden, num_classes <= 128).
    w_list, b_list, w_idx, b_idx = [], [], {}, {}

    def addw(key_, w):
        w_idx[key_] = len(w_list)
        w_list.append(w)

    def addb(key_, b):
        b_idx[key_] = len(b_list)
        b_list.append(b)                       # [1, 128] f32

    for nt in node_types:
        addw(("lin", nt), params["lins"][nt]["wt"])
        addb(("lin", nt), params["lins"][nt]["b"])
    for li, layer in enumerate(params["layers"]):
        for et in edge_types:
            prm = layer[et]
            addw(("w1", li, et), prm["w1t"])
            addb(("b1", li, et), prm["b1"])
            addw(("w2", li, et), prm["w2t"])
            addb(("b2", li, et), prm["b2"])
    # fold the 1/num_runs mean scale into the final weight (exact for pow-2 R)
    fwt = (params["final"]["wt"].astype(jnp.float32) * (1.0 / num_runs)).astype(jnp.bfloat16)
    addw(("final",), fwt)
    addb(("final",), params["final"]["b"])

    w_stack = jnp.stack(w_list, axis=0)                    # [num_w, 128, 128] bf16
    b_stack = jnp.stack(b_list, axis=0)                    # [num_b,   1, 128] f32

    eps_tbl = tuple(tuple(float(layer[et]["eps"]) for et in edge_types)
                    for layer in params["layers"])

    operands, specs = [], []

    def add(arr):
        operands.append(arr)
        specs.append(pl.BlockSpec(memory_space=pltpu.MemorySpace.VMEM))

    for nt in node_types:
        add(x_pad[nt])
    for nt in node_types:
        add(keep[nt])
    for et in edge_types:
        add(adjs[et])
    add(w_stack)
    add(b_stack)

    kernel = _make_fused_kernel(tuple(node_types), tuple(edge_types),
                                num_layers, num_runs, eps_tbl, out_node,
                                dict(n_pad), w_idx, b_idx)

    out_padded = pl.pallas_call(
        kernel,
        out_shape=jax.ShapeDtypeStruct((n_pad[out_node], c_pad), jnp.float32),
        in_specs=specs,
        out_specs=pl.BlockSpec(memory_space=pltpu.MemorySpace.VMEM),
    )(*operands)

    return out_padded[:n_nodes[out_node], :num_classes]


# ----------------------------------------------------------------------------
# main
# ----------------------------------------------------------------------------

if __name__ == "__main__":
    key = jax.random.PRNGKey(0)

    node_types = ["author", "paper"]
    edge_types = [("author", "writes", "paper"), ("paper", "written_by", "author")]
    in_channels_dict = {"author": 16, "paper": 8}
    hidden_channels = 32
    num_layers = 2
    num_classes = 4
    p = 0.3
    num_runs = 2

    n_author, n_paper = 24, 40
    n_edges = 64

    key, kx1, kx2, ke1a, ke1b, ke2a, ke2b, kparam, kdrop = jax.random.split(key, 9)
    x_dict = {
        "author": jax.random.normal(kx1, (n_author, in_channels_dict["author"]), jnp.float32),
        "paper": jax.random.normal(kx2, (n_paper, in_channels_dict["paper"]), jnp.float32),
    }
    edge_index_dict = {
        ("author", "writes", "paper"): jnp.stack([
            jax.random.randint(ke1a, (n_edges,), 0, n_author),
            jax.random.randint(ke1b, (n_edges,), 0, n_paper),
        ]),
        ("paper", "written_by", "author"): jnp.stack([
            jax.random.randint(ke2a, (n_edges,), 0, n_paper),
            jax.random.randint(ke2b, (n_edges,), 0, n_author),
        ]),
    }

    params = init_params(kparam, node_types, edge_types, in_channels_dict,
                         hidden_channels, num_layers, num_classes)

    out = drop_hetero_gin_forward(params, x_dict, edge_index_dict, node_types,
                                  hidden_channels, num_classes, num_layers,
                                  p, num_runs, kdrop)
    out = jax.block_until_ready(out)
    assert out.shape == (n_author, num_classes)
    assert bool(jnp.all(jnp.isfinite(out)))
    print("KERNEL_OK")
</pallas_src>

<mosaic_0001>
module attributes {stable_mosaic.version = 11 : i64} {
  func.func @kernel(%arg0: memref<128x128xbf16, #tpu.memory_space<vmem>>, %arg1: memref<128x128xbf16, #tpu.memory_space<vmem>>, %arg2: memref<256x128xf32, #tpu.memory_space<vmem>>, %arg3: memref<256x128xf32, #tpu.memory_space<vmem>>, %arg4: memref<128x128xbf16, #tpu.memory_space<vmem>>, %arg5: memref<128x128xbf16, #tpu.memory_space<vmem>>, %arg6: memref<11x128x128xbf16, #tpu.memory_space<vmem>>, %arg7: memref<11x1x128xf32, #tpu.memory_space<vmem>>, %arg8: memref<128x128xf32, #tpu.memory_space<vmem>>) attributes {dimension_semantics = [], scalar_prefetch = 0 : i64, scratch_operands = 0 : i64, tpu.core_type = #tpu.core_type<tc>} {
    %c0 = arith.constant 0 : index
    %c0_0 = arith.constant 0 : index
    %0 = vector.load %arg4[%c0, %c0_0] : memref<128x128xbf16, #tpu.memory_space<vmem>>, vector<128x128xbf16>
    %c0_1 = arith.constant 0 : index
    %c0_2 = arith.constant 0 : index
    %1 = vector.load %arg5[%c0_1, %c0_2] : memref<128x128xbf16, #tpu.memory_space<vmem>>, vector<128x128xbf16>
    %c0_3 = arith.constant 0 : index
    %c0_4 = arith.constant 0 : index
    %2 = vector.load %arg0[%c0_3, %c0_4] : memref<128x128xbf16, #tpu.memory_space<vmem>>, vector<128x128xbf16>
    %c0_5 = arith.constant 0 : index
    %c0_6 = arith.constant 0 : index
    %c0_7 = arith.constant 0 : index
    %3 = vector.load %arg6[%c0_5, %c0_6, %c0_7] : memref<11x128x128xbf16, #tpu.memory_space<vmem>>, vector<1x128x128xbf16>
    %4 = vector.shape_cast %3 : vector<1x128x128xbf16> to vector<128x128xbf16>
    %cst = arith.constant dense<0.000000e+00> : vector<128x128xf32>
    %5 = tpu.matmul %2, %4, %cst {dimension_numbers = #tpu.dot_dimension_numbers<[1], [0], [0], [1], [0, 0, 1, 1], [], []>} : vector<128x128xbf16>, vector<128x128xbf16>, vector<128x128xf32> -> vector<128x128xf32>
    %c0_8 = arith.constant 0 : index
    %c0_9 = arith.constant 0 : index
    %c0_10 = arith.constant 0 : index
    %6 = vector.load %arg7[%c0_8, %c0_9, %c0_10] : memref<11x1x128xf32, #tpu.memory_space<vmem>>, vector<1x1x128xf32>
    %7 = vector.shape_cast %6 : vector<1x1x128xf32> to vector<1x128xf32>
    %8 = vector.broadcast %7 : vector<1x128xf32> to vector<128x128xf32>
    %9 = arith.addf %5, %8 : vector<128x128xf32>
    %10 = tpu.concatenate %9, %9 in 0 : vector<128x128xf32>, vector<128x128xf32> -> vector<256x128xf32>
    %c0_11 = arith.constant 0 : index
    %c0_12 = arith.constant 0 : index
    %11 = vector.load %arg2[%c0_11, %c0_12] : memref<256x128xf32, #tpu.memory_space<vmem>>, vector<256x128xf32>
    %12 = arith.mulf %10, %11 : vector<256x128xf32>
    %c0_13 = arith.constant 0 : index
    %c0_14 = arith.constant 0 : index
    %13 = vector.load %arg1[%c0_13, %c0_14] : memref<128x128xbf16, #tpu.memory_space<vmem>>, vector<128x128xbf16>
    %c1 = arith.constant 1 : index
    %c0_15 = arith.constant 0 : index
    %c0_16 = arith.constant 0 : index
    %14 = vector.load %arg6[%c1, %c0_15, %c0_16] : memref<11x128x128xbf16, #tpu.memory_space<vmem>>, vector<1x128x128xbf16>
    %15 = vector.shape_cast %14 : vector<1x128x128xbf16> to vector<128x128xbf16>
    %cst_17 = arith.constant dense<0.000000e+00> : vector<128x128xf32>
    %16 = tpu.matmul %13, %15, %cst_17 {dimension_numbers = #tpu.dot_dimension_numbers<[1], [0], [0], [1], [0, 0, 1, 1], [], []>} : vector<128x128xbf16>, vector<128x128xbf16>, vector<128x128xf32> -> vector<128x128xf32>
    %c1_18 = arith.constant 1 : index
    %c0_19 = arith.constant 0 : index
    %c0_20 = arith.constant 0 : index
    %17 = vector.load %arg7[%c1_18, %c0_19, %c0_20] : memref<11x1x128xf32, #tpu.memory_space<vmem>>, vector<1x1x128xf32>
    %18 = vector.shape_cast %17 : vector<1x1x128xf32> to vector<1x128xf32>
    %19 = vector.broadcast %18 : vector<1x128xf32> to vector<128x128xf32>
    %20 = arith.addf %16, %19 : vector<128x128xf32>
    %21 = tpu.concatenate %20, %20 in 0 : vector<128x128xf32>, vector<128x128xf32> -> vector<256x128xf32>
    %c0_21 = arith.constant 0 : index
    %c0_22 = arith.constant 0 : index
    %22 = vector.load %arg3[%c0_21, %c0_22] : memref<256x128xf32, #tpu.memory_space<vmem>>, vector<256x128xf32>
    %23 = arith.mulf %21, %22 : vector<256x128xf32>
    %24 = vector.extract_strided_slice %12 {offsets = [0, 0], sizes = [128, 128], strides = [1, 1]} : vector<256x128xf32> to vector<128x128xf32>
    %25 = arith.truncf %24 : vector<128x128xf32> to vector<128x128xbf16>
    %cst_23 = arith.constant dense<0.000000e+00> : vector<128x128xf32>
    %26 = tpu.matmul %0, %25, %cst_23 {dimension_numbers = #tpu.dot_dimension_numbers<[1], [0], [0], [1], [0, 0, 1, 1], [], []>} : vector<128x128xbf16>, vector<128x128xbf16>, vector<128x128xf32> -> vector<128x128xf32>
    %27 = vector.extract_strided_slice %23 {offsets = [0, 0], sizes = [128, 128], strides = [1, 1]} : vector<256x128xf32> to vector<128x128xf32>
    %28 = arith.addf %27, %26 : vector<128x128xf32>
    %29 = vector.extract_strided_slice %23 {offsets = [128, 0], sizes = [128, 128], strides = [1, 1]} : vector<256x128xf32> to vector<128x128xf32>
    %30 = tpu.concatenate %28, %29 in 0 : vector<128x128xf32>, vector<128x128xf32> -> vector<256x128xf32>
    %31 = arith.truncf %30 : vector<256x128xf32> to vector<256x128xbf16>
    %c2 = arith.constant 2 : index
    %c0_24 = arith.constant 0 : index
    %c0_25 = arith.constant 0 : index
    %32 = vector.load %arg6[%c2, %c0_24, %c0_25] : memref<11x128x128xbf16, #tpu.memory_space<vmem>>, vector<1x128x128xbf16>
    %33 = vector.shape_cast %32 : vector<1x128x128xbf16> to vector<128x128xbf16>
    %cst_26 = arith.constant dense<0.000000e+00> : vector<256x128xf32>
    %34 = tpu.matmul %31, %33, %cst_26 {dimension_numbers = #tpu.dot_dimension_numbers<[1], [0], [0], [1], [0, 0, 1, 1], [], []>} : vector<256x128xbf16>, vector<128x128xbf16>, vector<256x128xf32> -> vector<256x128xf32>
    %c2_27 = arith.constant 2 : index
    %c0_28 = arith.constant 0 : index
    %c0_29 = arith.constant 0 : index
    %35 = vector.load %arg7[%c2_27, %c0_28, %c0_29] : memref<11x1x128xf32, #tpu.memory_space<vmem>>, vector<1x1x128xf32>
    %36 = vector.shape_cast %35 : vector<1x1x128xf32> to vector<1x128xf32>
    %37 = vector.broadcast %36 : vector<1x128xf32> to vector<256x128xf32>
    %38 = arith.addf %34, %37 : vector<256x128xf32>
    %cst_30 = arith.constant 0.000000e+00 : f32
    %39 = vector.broadcast %cst_30 : f32 to vector<256x128xf32>
    %40 = arith.maximumf %38, %39 : vector<256x128xf32>
    %41 = arith.truncf %40 : vector<256x128xf32> to vector<256x128xbf16>
    %c3 = arith.constant 3 : index
    %c0_31 = arith.constant 0 : index
    %c0_32 = arith.constant 0 : index
    %42 = vector.load %arg6[%c3, %c0_31, %c0_32] : memref<11x128x128xbf16, #tpu.memory_space<vmem>>, vector<1x128x128xbf16>
    %43 = vector.shape_cast %42 : vector<1x128x128xbf16> to vector<128x128xbf16>
    %cst_33 = arith.constant dense<0.000000e+00> : vector<256x128xf32>
    %44 = tpu.matmul %41, %43, %cst_33 {dimension_numbers = #tpu.dot_dimension_numbers<[1], [0], [0], [1], [0, 0, 1, 1], [], []>} : vector<256x128xbf16>, vector<128x128xbf16>, vector<256x128xf32> -> vector<256x128xf32>
    %c3_34 = arith.constant 3 : index
    %c0_35 = arith.constant 0 : index
    %c0_36 = arith.constant 0 : index
    %45 = vector.load %arg7[%c3_34, %c0_35, %c0_36] : memref<11x1x128xf32, #tpu.memory_space<vmem>>, vector<1x1x128xf32>
    %46 = vector.shape_cast %45 : vector<1x1x128xf32> to vector<1x128xf32>
    %47 = vector.broadcast %46 : vector<1x128xf32> to vector<256x128xf32>
    %48 = arith.addf %44, %47 : vector<256x128xf32>
    %cst_37 = arith.constant 0.000000e+00 : f32
    %49 = vector.broadcast %cst_37 : f32 to vector<256x128xf32>
    %50 = arith.maximumf %48, %49 : vector<256x128xf32>
    %51 = vector.extract_strided_slice %23 {offsets = [0, 0], sizes = [128, 128], strides = [1, 1]} : vector<256x128xf32> to vector<128x128xf32>
    %52 = arith.truncf %51 : vector<128x128xf32> to vector<128x128xbf16>
    %cst_38 = arith.constant dense<0.000000e+00> : vector<128x128xf32>
    %53 = tpu.matmul %1, %52, %cst_38 {dimension_numbers = #tpu.dot_dimension_numbers<[1], [0], [0], [1], [0, 0, 1, 1], [], []>} : vector<128x128xbf16>, vector<128x128xbf16>, vector<128x128xf32> -> vector<128x128xf32>
    %54 = vector.extract_strided_slice %12 {offsets = [0, 0], sizes = [128, 128], strides = [1, 1]} : vector<256x128xf32> to vector<128x128xf32>
    %55 = arith.addf %54, %53 : vector<128x128xf32>
    %56 = vector.extract_strided_slice %12 {offsets = [128, 0], sizes = [128, 128], strides = [1, 1]} : vector<256x128xf32> to vector<128x128xf32>
    %57 = tpu.concatenate %55, %56 in 0 : vector<128x128xf32>, vector<128x128xf32> -> vector<256x128xf32>
    %58 = arith.truncf %57 : vector<256x128xf32> to vector<256x128xbf16>
    %c4 = arith.constant 4 : index
    %c0_39 = arith.constant 0 : index
    %c0_40 = arith.constant 0 : index
    %59 = vector.load %arg6[%c4, %c0_39, %c0_40] : memref<11x128x128xbf16, #tpu.memory_space<vmem>>, vector<1x128x128xbf16>
    %60 = vector.shape_cast %59 : vector<1x128x128xbf16> to vector<128x128xbf16>
    %cst_41 = arith.constant dense<0.000000e+00> : vector<256x128xf32>
    %61 = tpu.matmul %58, %60, %cst_41 {dimension_numbers = #tpu.dot_dimension_numbers<[1], [0], [0], [1], [0, 0, 1, 1], [], []>} : vector<256x128xbf16>, vector<128x128xbf16>, vector<256x128xf32> -> vector<256x128xf32>
    %c4_42 = arith.constant 4 : index
    %c0_43 = arith.constant 0 : index
    %c0_44 = arith.constant 0 : index
    %62 = vector.load %arg7[%c4_42, %c0_43, %c0_44] : memref<11x1x128xf32, #tpu.memory_space<vmem>>, vector<1x1x128xf32>
    %63 = vector.shape_cast %62 : vector<1x1x128xf32> to vector<1x128xf32>
    %64 = vector.broadcast %63 : vector<1x128xf32> to vector<256x128xf32>
    %65 = arith.addf %61, %64 : vector<256x128xf32>
    %cst_45 = arith.constant 0.000000e+00 : f32
    %66 = vector.broadcast %cst_45 : f32 to vector<256x128xf32>
    %67 = arith.maximumf %65, %66 : vector<256x128xf32>
    %68 = arith.truncf %67 : vector<256x128xf32> to vector<256x128xbf16>
    %c5 = arith.constant 5 : index
    %c0_46 = arith.constant 0 : index
    %c0_47 = arith.constant 0 : index
    %69 = vector.load %arg6[%c5, %c0_46, %c0_47] : memref<11x128x128xbf16, #tpu.memory_space<vmem>>, vector<1x128x128xbf16>
    %70 = vector.shape_cast %69 : vector<1x128x128xbf16> to vector<128x128xbf16>
    %cst_48 = arith.constant dense<0.000000e+00> : vector<256x128xf32>
    %71 = tpu.matmul %68, %70, %cst_48 {dimension_numbers = #tpu.dot_dimension_numbers<[1], [0], [0], [1], [0, 0, 1, 1], [], []>} : vector<256x128xbf16>, vector<128x128xbf16>, vector<256x128xf32> -> vector<256x128xf32>
    %c5_49 = arith.constant 5 : index
    %c0_50 = arith.constant 0 : index
    %c0_51 = arith.constant 0 : index
    %72 = vector.load %arg7[%c5_49, %c0_50, %c0_51] : memref<11x1x128xf32, #tpu.memory_space<vmem>>, vector<1x1x128xf32>
    %73 = vector.shape_cast %72 : vector<1x1x128xf32> to vector<1x128xf32>
    %74 = vector.broadcast %73 : vector<1x128xf32> to vector<256x128xf32>
    %75 = arith.addf %71, %74 : vector<256x128xf32>
    %cst_52 = arith.constant 0.000000e+00 : f32
    %76 = vector.broadcast %cst_52 : f32 to vector<256x128xf32>
    %77 = arith.maximumf %75, %76 : vector<256x128xf32>
    %78 = vector.extract_strided_slice %50 {offsets = [0, 0], sizes = [128, 128], strides = [1, 1]} : vector<256x128xf32> to vector<128x128xf32>
    %79 = arith.truncf %78 : vector<128x128xf32> to vector<128x128xbf16>
    %cst_53 = arith.constant dense<0.000000e+00> : vector<128x128xf32>
    %80 = tpu.matmul %1, %79, %cst_53 {dimension_numbers = #tpu.dot_dimension_numbers<[1], [0], [0], [1], [0, 0, 1, 1], [], []>} : vector<128x128xbf16>, vector<128x128xbf16>, vector<128x128xf32> -> vector<128x128xf32>
    %81 = vector.extract_strided_slice %77 {offsets = [0, 0], sizes = [128, 128], strides = [1, 1]} : vector<256x128xf32> to vector<128x128xf32>
    %82 = arith.addf %81, %80 : vector<128x128xf32>
    %83 = vector.extract_strided_slice %77 {offsets = [128, 0], sizes = [128, 128], strides = [1, 1]} : vector<256x128xf32> to vector<128x128xf32>
    %84 = tpu.concatenate %82, %83 in 0 : vector<128x128xf32>, vector<128x128xf32> -> vector<256x128xf32>
    %85 = arith.truncf %84 : vector<256x128xf32> to vector<256x128xbf16>
    %c8 = arith.constant 8 : index
    %c0_54 = arith.constant 0 : index
    %c0_55 = arith.constant 0 : index
    %86 = vector.load %arg6[%c8, %c0_54, %c0_55] : memref<11x128x128xbf16, #tpu.memory_space<vmem>>, vector<1x128x128xbf16>
    %87 = vector.shape_cast %86 : vector<1x128x128xbf16> to vector<128x128xbf16>
    %cst_56 = arith.constant dense<0.000000e+00> : vector<256x128xf32>
    %88 = tpu.matmul %85, %87, %cst_56 {dimension_numbers = #tpu.dot_dimension_numbers<[1], [0], [0], [1], [0, 0, 1, 1], [], []>} : vector<256x128xbf16>, vector<128x128xbf16>, vector<256x128xf32> -> vector<256x128xf32>
    %c8_57 = arith.constant 8 : index
    %c0_58 = arith.constant 0 : index
    %c0_59 = arith.constant 0 : index
    %89 = vector.load %arg7[%c8_57, %c0_58, %c0_59] : memref<11x1x128xf32, #tpu.memory_space<vmem>>, vector<1x1x128xf32>
    %90 = vector.shape_cast %89 : vector<1x1x128xf32> to vector<1x128xf32>
    %91 = vector.broadcast %90 : vector<1x128xf32> to vector<256x128xf32>
    %92 = arith.addf %88, %91 : vector<256x128xf32>
    %cst_60 = arith.constant 0.000000e+00 : f32
    %93 = vector.broadcast %cst_60 : f32 to vector<256x128xf32>
    %94 = arith.maximumf %92, %93 : vector<256x128xf32>
    %95 = arith.truncf %94 : vector<256x128xf32> to vector<256x128xbf16>
    %c9 = arith.constant 9 : index
    %c0_61 = arith.constant 0 : index
    %c0_62 = arith.constant 0 : index
    %96 = vector.load %arg6[%c9, %c0_61, %c0_62] : memref<11x128x128xbf16, #tpu.memory_space<vmem>>, vector<1x128x128xbf16>
    %97 = vector.shape_cast %96 : vector<1x128x128xbf16> to vector<128x128xbf16>
    %cst_63 = arith.constant dense<0.000000e+00> : vector<256x128xf32>
    %98 = tpu.matmul %95, %97, %cst_63 {dimension_numbers = #tpu.dot_dimension_numbers<[1], [0], [0], [1], [0, 0, 1, 1], [], []>} : vector<256x128xbf16>, vector<128x128xbf16>, vector<256x128xf32> -> vector<256x128xf32>
    %c9_64 = arith.constant 9 : index
    %c0_65 = arith.constant 0 : index
    %c0_66 = arith.constant 0 : index
    %99 = vector.load %arg7[%c9_64, %c0_65, %c0_66] : memref<11x1x128xf32, #tpu.memory_space<vmem>>, vector<1x1x128xf32>
    %100 = vector.shape_cast %99 : vector<1x1x128xf32> to vector<1x128xf32>
    %101 = vector.broadcast %100 : vector<1x128xf32> to vector<256x128xf32>
    %102 = arith.addf %98, %101 : vector<256x128xf32>
    %cst_67 = arith.constant 0.000000e+00 : f32
    %103 = vector.broadcast %cst_67 : f32 to vector<256x128xf32>
    %104 = arith.maximumf %102, %103 : vector<256x128xf32>
    %105 = vector.extract_strided_slice %104 {offsets = [0, 0], sizes = [128, 128], strides = [1, 1]} : vector<256x128xf32> to vector<128x128xf32>
    %106 = vector.extract_strided_slice %104 {offsets = [128, 0], sizes = [128, 128], strides = [1, 1]} : vector<256x128xf32> to vector<128x128xf32>
    %107 = arith.addf %105, %106 : vector<128x128xf32>
    %108 = arith.truncf %107 : vector<128x128xf32> to vector<128x128xbf16>
    %c10 = arith.constant 10 : index
    %c0_68 = arith.constant 0 : index
    %c0_69 = arith.constant 0 : index
    %109 = vector.load %arg6[%c10, %c0_68, %c0_69] : memref<11x128x128xbf16, #tpu.memory_space<vmem>>, vector<1x128x128xbf16>
    %110 = vector.shape_cast %109 : vector<1x128x128xbf16> to vector<128x128xbf16>
    %cst_70 = arith.constant dense<0.000000e+00> : vector<128x128xf32>
    %111 = tpu.matmul %108, %110, %cst_70 {dimension_numbers = #tpu.dot_dimension_numbers<[1], [0], [0], [1], [0, 0, 1, 1], [], []>} : vector<128x128xbf16>, vector<128x128xbf16>, vector<128x128xf32> -> vector<128x128xf32>
    %c10_71 = arith.constant 10 : index
    %c0_72 = arith.constant 0 : index
    %c0_73 = arith.constant 0 : index
    %112 = vector.load %arg7[%c10_71, %c0_72, %c0_73] : memref<11x1x128xf32, #tpu.memory_space<vmem>>, vector<1x1x128xf32>
    %113 = vector.shape_cast %112 : vector<1x1x128xf32> to vector<1x128xf32>
    %114 = vector.broadcast %113 : vector<1x128xf32> to vector<128x128xf32>
    %115 = arith.addf %111, %114 : vector<128x128xf32>
    %c0_74 = arith.constant 0 : index
    %c0_75 = arith.constant 0 : index
    %116 = vector.load %arg8[%c0_74, %c0_75] : memref<128x128xf32, #tpu.memory_space<vmem>>, vector<128x128xf32>
    tpu.vector_store %arg8[%c0_74, %c0_75], %115 {strides = array<i32>} : memref<128x128xf32, #tpu.memory_space<vmem>>, vector<128x128xf32>,
    return
  }
}

</mosaic_0001>

<bundles_post_ra>
// kernel: tpu_custom_call.1
= control target key start
LH: loop header
LB: loop body
LE: loop exit
PB: predicated region body
PF: predicated region fallthrough
CT: control target
= control target key end

     0   :  { %13 = vsyncpa [#allocation3], 0  ;;  %s5021_s0 = inlined_call_operand.hbm [shape: bf16[128,128], index: 0, kind: input, shape index: {}]   ;;  %s5022_s1 = inlined_call_operand.hbm [shape: bf16[128,128], index: 1, kind: input, shape index: {}]   ;;  %s5023_s2 = inlined_call_operand.hbm [shape: f32[256,128], index: 2, kind: input, shape index: {}]   ;;  %s5024_s3 = inlined_call_operand.hbm [shape: f32[256,128], index: 3, kind: input, shape index: {}]   ;;  %s5025_s4 = inlined_call_operand.hbm [shape: bf16[128,128], index: 4, kind: input, shape index: {}]   ;;  %s5026_s5 = inlined_call_operand.hbm [shape: bf16[128,128], index: 5, kind: input, shape index: {}]   ;;  %s5027_s6 = inlined_call_operand.hbm [shape: bf16[11,128,128], index: 6, kind: input, shape index: {}]   ;;  %s5028_s7 = inlined_call_operand.vmem [shape: f32[11,1,128], index: 7, kind: input, shape index: {}]   ;;  %s5029_s8 = inlined_call_operand.hbm [shape: f32[128,128], index: 8, kind: output, shape index: {}]  }
   0x1   :  { %14 = vsyncpa [#allocation6], 0 }
   0x2   :  { %15 = vsyncpa [#allocation9], 0 }
   0x3   :  { %16 = vsyncpa [#allocation12], 0 }
   0x4   :  { %17 = vsyncpa [#allocation4], 0  ;;  %s4244_s27 = smov [#allocation5]   ;;  %s4058_s9 = scalar_lea.hbm %s5022_s1, 1024 }
   0x5   :  { %s35_s28 = sshll.u32 %s4244_s27, 4  ;;  %p4059_p0 = scmp.ne.s32.totalorder %s5022_s1, %s4058_s9  ;;  %s36_s28 = int_to_ptr.vmem [resolvable:$true] %s35_s28 }
   0x6   :  { %p4062_p1 = scmp.lt.u32.totalorder %s4058_s9, %s5022_s1 }
   0x8   :  { %p4064_p2 = pnand %p4062_p1, %p4059_p0 }
   0xa   :  { %4067 = shalt.err (!%p4064_p2)
}
   0xb   :  { %s4068_s14 = scalar_lea.vmem %s36_s28, 1024  ;;  %p4073_p4 = scmp.lt.s32.totalorder %s36_s28, %s36_s28 }
   0xc   :  { %p4069_p3 = scmp.ne.s32.totalorder %s36_s28, %s4068_s14  ;;  %p4074_p5 = scmp.lt.s32.totalorder %s4068_s14, %s4068_s14 }
   0xe   :  { %p4075_p6 = por %p4074_p5, %p4073_p4 }
  0x10   :  { %p4076_p7 = pnand %p4075_p6, %p4069_p3 }
  0x12   :  { %4079 = shalt.err (!%p4076_p7)
}
  0x13   :  { %s4245_s15 = smov 64   ;;  %s4246_s16 = smov 4  }
  0x14   :  { %41 = dma.hbm_to_vmem [thread:$0]  %s5022_s1, 1024, %s36_s28, [#allocation6], %s4245_s15, %s4245_s15, %s4246_s16  }
  0x15   :  { %s4247_s19 = smov [#allocation8]   ;;  %s4248_s21 = smov [#allocation11]  }
  0x16   :  { %s59_s20 = sshll.u32 %s4247_s19, 4  ;;  %s83_s22 = sshll.u32 %s4248_s21, 4  ;;  %s60_s20 = int_to_ptr.vmem [resolvable:$true] %s59_s20  ;;  %s84_s22 = int_to_ptr.vmem [resolvable:$true] %s83_s22 }
  0x17   :  { %s4080_s25 = scalar_lea.hbm %s5024_s3, 4096 }
  0x18   :  { %p4081_p8 = scmp.ne.s32.totalorder %s5024_s3, %s4080_s25  ;;  %p4084_p9 = scmp.lt.u32.totalorder %s4080_s25, %s5024_s3 }
  0x1a   :  { %p4086_p10 = pnand %p4084_p9, %p4081_p8 }
  0x1c   :  { %4089 = shalt.err (!%p4086_p10)
}
  0x1d   :  { %s4090_s1 = scalar_lea.vmem %s60_s20, 4096  ;;  %p4095_p12 = scmp.lt.s32.totalorder %s60_s20, %s60_s20 }
  0x1e   :  { %p4091_p11 = scmp.ne.s32.totalorder %s60_s20, %s4090_s1  ;;  %p4096_p13 = scmp.lt.s32.totalorder %s4090_s1, %s4090_s1 }
  0x20   :  { %p4097_p0 = por %p4096_p13, %p4095_p12 }
  0x22   :  { %p4098_p1 = pnand %p4097_p0, %p4091_p11 }
  0x24   :  { %4101 = shalt.err (!%p4098_p1)
}
  0x25   :  { %s4249_s28 = smov 128   ;;  %s4250_s9 = smov 8  }
  0x26   :  { %65 = dma.hbm_to_vmem [thread:$0]  %s5024_s3, 4096, %s60_s20, [#allocation9], %s4249_s28, %s4249_s28, %s4250_s9  }
  0x27   :  { %s4102_s14 = scalar_lea.hbm %s5026_s5, 1024 }
  0x28   :  { %p4103_p2 = scmp.ne.s32.totalorder %s5026_s5, %s4102_s14  ;;  %p4106_p3 = scmp.lt.u32.totalorder %s4102_s14, %s5026_s5 }
  0x2a   :  { %p4108_p4 = pnand %p4106_p3, %p4103_p2 }
  0x2c   :  { %4111 = shalt.err (!%p4108_p4)
}
  0x2d   :  { %s4112_s23 = scalar_lea.vmem %s84_s22, 1024  ;;  %p4117_p6 = scmp.lt.s32.totalorder %s84_s22, %s84_s22 }
  0x2e   :  { %p4113_p5 = scmp.ne.s32.totalorder %s84_s22, %s4112_s23  ;;  %p4118_p7 = scmp.lt.s32.totalorder %s4112_s23, %s4112_s23 }
  0x30   :  { %p4119_p8 = por %p4118_p7, %p4117_p6 }
  0x32   :  { %p4120_p9 = pnand %p4119_p8, %p4113_p5 }
  0x34   :  { %4123 = shalt.err (!%p4120_p9)
}
  0x35   :  { %89 = dma.hbm_to_vmem [thread:$0]  %s5026_s5, 1024, %s84_s22, [#allocation12], %s4245_s15, %s4245_s15, %s4246_s16  }
  0x36   :  { %s4251_s24 = smov [#allocation2]   ;;  %s4252_s26 = smov [#allocation7]  }
  0x37   :  { %s23_s25 = sshll.u32 %s4251_s24, 4  ;;  %s47_s27 = sshll.u32 %s4252_s26, 4  ;;  %s24_s25 = int_to_ptr.vmem [resolvable:$true] %s23_s25  ;;  %s48_s27 = int_to_ptr.vmem [resolvable:$true] %s47_s27 }
  0x38   :  { %s4124_s1 = scalar_lea.hbm %s5021_s0, 1024 }
  0x39   :  { %p4125_p10 = scmp.ne.s32.totalorder %s5021_s0, %s4124_s1  ;;  %p4128_p11 = scmp.lt.u32.totalorder %s4124_s1, %s5021_s0 }
  0x3b   :  { %p4130_p12 = pnand %p4128_p11, %p4125_p10 }
  0x3d   :  { %4133 = shalt.err (!%p4130_p12)
}
  0x3e   :  { %s4134_s5 = scalar_lea.vmem %s24_s25, 1024  ;;  %p4139_p0 = scmp.lt.s32.totalorder %s24_s25, %s24_s25 }
  0x3f   :  { %p4135_p13 = scmp.ne.s32.totalorder %s24_s25, %s4134_s5  ;;  %p4140_p1 = scmp.lt.s32.totalorder %s4134_s5, %s4134_s5 }
  0x41   :  { %p4141_p2 = por %p4140_p1, %p4139_p0 }
  0x43   :  { %p4142_p3 = pnand %p4141_p2, %p4135_p13 }
  0x45   :  { %4145 = shalt.err (!%p4142_p3)
}
  0x46   :  { %29 = dma.hbm_to_vmem [thread:$0]  %s5021_s0, 1024, %s24_s25, [#allocation3], %s4245_s15, %s4245_s15, %s4246_s16  }
  0x47   :  { %s4146_s19 = scalar_lea.hbm %s5023_s2, 4096 }
  0x48   :  { %p4147_p4 = scmp.ne.s32.totalorder %s5023_s2, %s4146_s19  ;;  %p4150_p5 = scmp.lt.u32.totalorder %s4146_s19, %s5023_s2 }
  0x4a   :  { %p4152_p6 = pnand %p4150_p5, %p4147_p4 }
  0x4c   :  { %4155 = shalt.err (!%p4152_p6)
}
  0x4d   :  { %s4156_s24 = scalar_lea.vmem %s48_s27, 4096  ;;  %p4161_p8 = scmp.lt.s32.totalorder %s48_s27, %s48_s27 }
  0x4e   :  { %p4157_p7 = scmp.ne.s32.totalorder %s48_s27, %s4156_s24  ;;  %p4162_p9 = scmp.lt.s32.totalorder %s4156_s24, %s4156_s24 }
  0x50   :  { %p4163_p10 = por %p4162_p9, %p4161_p8 }
  0x52   :  { %p4164_p11 = pnand %p4163_p10, %p4157_p7 }
  0x54   :  { %4167 = shalt.err (!%p4164_p11)
}
  0x55   :  { %53 = dma.hbm_to_vmem [thread:$0]  %s5023_s2, 4096, %s48_s27, [#allocation6], %s4249_s28, %s4249_s28, %s4250_s9  }
  0x56   :  { %s4253_s26 = smov [#allocation10]   ;;  %s4254_s30 = smov [#allocation13]  }
  0x57   :  { %s71_s29 = sshll.u32 %s4253_s26, 4  ;;  %s95_s1 = sshll.u32 %s4254_s30, 4  ;;  %s72_s29 = int_to_ptr.vmem [resolvable:$true] %s71_s29  ;;  %s96_s1 = int_to_ptr.vmem [resolvable:$true] %s95_s1 }
  0x58   :  { %s4168_s12 = scalar_lea.hbm %s5025_s4, 1024 }
  0x59   :  { %p4169_p12 = scmp.ne.s32.totalorder %s5025_s4, %s4168_s12  ;;  %p4172_p13 = scmp.lt.u32.totalorder %s4168_s12, %s5025_s4 }
  0x5b   :  { %p4174_p0 = pnand %p4172_p13, %p4169_p12 }
  0x5d   :  { %4177 = shalt.err (!%p4174_p0)
}
  0x5e   :  { %s4178_s2 = scalar_lea.vmem %s72_s29, 1024  ;;  %p4183_p2 = scmp.lt.s32.totalorder %s72_s29, %s72_s29 }
  0x5f   :  { %p4179_p1 = scmp.ne.s32.totalorder %s72_s29, %s4178_s2  ;;  %p4184_p3 = scmp.lt.s32.totalorder %s4178_s2, %s4178_s2 }
  0x61   :  { %p4185_p4 = por %p4184_p3, %p4183_p2 }
  0x63   :  { %p4186_p5 = pnand %p4185_p4, %p4179_p1 }
  0x65   :  { %4189 = shalt.err (!%p4186_p5)
}
  0x66   :  { %77 = dma.hbm_to_vmem [thread:$0]  %s5025_s4, 1024, %s72_s29, [#allocation9], %s4245_s15, %s4245_s15, %s4246_s16  }
  0x67   :  { %s4190_s21 = scalar_lea.hbm %s5027_s6, 11264 }
  0x68   :  { %p4191_p6 = scmp.ne.s32.totalorder %s5027_s6, %s4190_s21  ;;  %p4194_p7 = scmp.lt.u32.totalorder %s4190_s21, %s5027_s6 }
  0x6a   :  { %p4196_p8 = pnand %p4194_p7, %p4191_p6 }
  0x6c   :  { %4199 = shalt.err (!%p4196_p8)
}
  0x6d   :  { %s4200_s0 = scalar_lea.vmem %s96_s1, 11264  ;;  %p4205_p10 = scmp.lt.s32.totalorder %s96_s1, %s96_s1 }
  0x6e   :  { %p4201_p9 = scmp.ne.s32.totalorder %s96_s1, %s4200_s0  ;;  %p4206_p11 = scmp.lt.s32.totalorder %s4200_s0, %s4200_s0 }
  0x70   :  { %p4207_p12 = por %p4206_p11, %p4205_p10 }
  0x72   :  { %p4208_p13 = pnand %p4207_p12, %p4201_p9 }
  0x74   :  { %4211 = shalt.err (!%p4208_p13)
}
  0x75   :  { %101 = dma.hbm_to_vmem [thread:$0]  %s5027_s6, 11264, %s96_s1, [#allocation12], %s4245_s15, %s4245_s15, %s4246_s16  }
  0x76   :  { %4234 = dma.done.wait [#allocation3], 1024  }
  0x77   :  { %4235 = vsyncadd [#allocation3], 4294966272 }
  0x78   :  { %4236 = dma.done.wait [#allocation6], 5120  }
  0x79   :  { %4237 = vsyncadd [#allocation6], 4294962176 }
  0x7a   :  { %4238 = dma.done.wait [#allocation9], 5120  }
  0x7b   :  { %4239 = vsyncadd [#allocation9], 4294962176 }
  0x7c   :  { %4240 = dma.done.wait [#allocation12], 12288  }
  0x7d   :  { %4241 = vsyncadd [#allocation12], 4294955008  ;;  %v3954_v0 = vld [vmem:[#allocation13] sm:$0xff]   ;;  %v3955_v1 = vld [vmem:[#allocation13 + $0x8] sm:$0xff]  }
  0x7e   :  { %3462 = vmatprep.subr.bf16.mxu0 %v3954_v0  ;;  %v3956_v2 = vld [vmem:[#allocation13 + $0x10] sm:$0xff]   ;;  %v3957_v3 = vld [vmem:[#allocation13 + $0x18] sm:$0xff]   ;;  %v3962_v4 = vld [vmem:[#allocation2] sm:$0xff]  }
  0x7f   :  { %3463 = vmatpush3.bf16.msra.mxu0 %v3954_v0  ;;  %3478 = vmatprep.mubr.bf16.mxu0 %v3962_v4  ;;  %v3958_v5 = vld [vmem:[#allocation13 + $0x20] sm:$0xff]   ;;  %v3959_v6 = vld [vmem:[#allocation13 + $0x28] sm:$0xff]   ;;  %v3960_v7 = vld [vmem:[#allocation13 + $0x30] sm:$0xff]  }
  0x80   :  { %3464 = vmatprep.subr.bf16.mxu0 %v3955_v1  ;;  %v3961_v8 = vld [vmem:[#allocation13 + $0x38] sm:$0xff]   ;;  %v3963_v9 = vld [vmem:[#allocation2 + $0x8] sm:$0xff]   ;;  %v3964_v10 = vld [vmem:[#allocation2 + $0x10] sm:$0xff]  }
  0x81   :  { %v3965_v11 = vld [vmem:[#allocation2 + $0x18] sm:$0xff]   ;;  %v3966_v12 = vld [vmem:[#allocation2 + $0x20] sm:$0xff]   ;;  %v3967_v13 = vld [vmem:[#allocation2 + $0x28] sm:$0xff]  }
  0x82   :  { %v3968_v14 = vld [vmem:[#allocation2 + $0x30] sm:$0xff]   ;;  %v3969_v15 = vld [vmem:[#allocation2 + $0x38] sm:$0xff]   ;;  %v3970_v16 = vld [vmem:[#allocation13 + $0x40] sm:$0xff]  }
  0x83   :  { %3465 = vmatpush3.bf16.msra.mxu0 %v3955_v1  ;;  %3494 = vmatprep.subr.bf16.mxu1 %v3970_v16  ;;  %v3971_v17 = vld [vmem:[#allocation13 + $0x48] sm:$0xff]   ;;  %v3972_v18 = vld [vmem:[#allocation13 + $0x50] sm:$0xff]   ;;  %v3973_v19 = vld [vmem:[#allocation13 + $0x58] sm:$0xff]  }
  0x84   :  { %3466 = vmatprep.subr.bf16.mxu0 %v3956_v2  ;;  %3495 = vmatpush3.bf16.msra.mxu1 %v3970_v16  ;;  %v3974_v20 = vld [vmem:[#allocation13 + $0x60] sm:$0xff]   ;;  %v3975_v21 = vld [vmem:[#allocation13 + $0x68] sm:$0xff]   ;;  %v3976_v22 = vld [vmem:[#allocation13 + $0x70] sm:$0xff]  }
  0x85   :  { %3496 = vmatprep.subr.bf16.mxu1 %v3971_v17  ;;  %v3977_v23 = vld [vmem:[#allocation13 + $0x78] sm:$0xff]   ;;  %v3978_v24 = vld [vmem:[#allocation5] sm:$0xff]   ;;  %v3979_v25 = vld [vmem:[#allocation5 + $0x8] sm:$0xff]  }
  0x86   :  { %3510 = vmatprep.mubr.bf16.mxu1 %v3978_v24  ;;  %v3980_v26 = vld [vmem:[#allocation10] sm:$0xff]   ;;  %v3982_v27 = vld [vmem:[#allocation5 + $0x10] sm:$0xff]   ;;  %v3983_v28 = vld [vmem:[#allocation5 + $0x18] sm:$0xff]  }
  0x87   :  { %3467 = vmatpush3.bf16.msra.mxu0 %v3956_v2  ;;  %v3986_v29 = vld [vmem:[#allocation5 + $0x20] sm:$0xff]   ;;  %v3987_v30 = vld [vmem:[#allocation5 + $0x28] sm:$0xff]   ;;  %v3990_v31 = vld [vmem:[#allocation5 + $0x30] sm:$0xff]  }
  0x88   :  { %3468 = vmatprep.subr.bf16.mxu0 %v3957_v3  ;;  %3497 = vmatpush3.bf16.msra.mxu1 %v3971_v17  ;;  %v3991_v32 = vld [vmem:[#allocation5 + $0x38] sm:$0xff]   ;;  %v3994_v33 = vld [vmem:[#allocation13 + $0x80] sm:$0xff]   ;;  %v3995_v34 = vld [vmem:[#allocation13 + $0x88] sm:$0xff]  }
  0x89   :  { %3498 = vmatprep.subr.bf16.mxu1 %v3972_v18  ;;  %v3996_v35 = vld [vmem:[#allocation13 + $0x90] sm:$0xff]   ;;  %v3997_v36 = vld [vmem:[#allocation13 + $0x98] sm:$0xff]   ;;  %v3998_v37 = vld [vmem:[#allocation13 + $0xa0] sm:$0xff]  }
  0x8a   :  { %v3999_v38 = vld [vmem:[#allocation13 + $0xa8] sm:$0xff]   ;;  %v4000_v39 = vld [vmem:[#allocation13 + $0xb0] sm:$0xff]   ;;  %v4409_v40 = vld [vmem:[%s5028_s7] ss:$0 sm:$0xff] }
  0x8b   :  { %3469 = vmatpush3.bf16.msra.mxu0 %v3957_v3  ;;  %v408_v43 = vld [vmem:[#allocation7 + $0x90] sm:$0xff]  ;;  %v390_v46 = vld [vmem:[#allocation7] sm:$0xff]  ;;  %v409_v49 = vld [vmem:[#allocation7 + $0x98] sm:$0xff] }
  0x8c   :  { %3470 = vmatprep.subr.bf16.mxu0 %v3958_v5  ;;  %3499 = vmatpush3.bf16.msra.mxu1 %v3972_v18  ;;  %v406_v47 = vld [vmem:[#allocation7 + $0x80] sm:$0xff]  ;;  %v393_v51 = vld [vmem:[#allocation7 + $0x18] sm:$0xff]  ;;  %v391_v53 = vld [vmem:[#allocation7 + $0x8] sm:$0xff] }
  0x8d   :  { %3500 = vmatprep.subr.bf16.mxu1 %v3973_v19  ;;  %v407_v54 = vld [vmem:[#allocation7 + $0x88] sm:$0xff]  ;;  %v392_v56 = vld [vmem:[#allocation7 + $0x10] sm:$0xff]  ;;  %v692_v0 = vld [vmem:[#allocation8 + $0x20] sm:$0xff] }
  0x8e   :  { %v395_v17 = vld [vmem:[#allocation7 + $0x28] sm:$0xff] }
  0x8f   :  { %3471 = vmatpush3.bf16.msra.mxu0 %v3958_v5  ;;  %v411_v18 = vld [vmem:[#allocation7 + $0xa8] sm:$0xff] }
  0x90   :  { %3472 = vmatprep.subr.bf16.mxu0 %v3959_v6  ;;  %3501 = vmatpush3.bf16.msra.mxu1 %v3973_v19  ;;  %v693_v4 = vld [vmem:[#allocation8 + $0x28] sm:$0xff] }
  0x91   :  { %3502 = vmatprep.subr.bf16.mxu1 %v3974_v20 }
  0x93   :  { %3473 = vmatpush3.bf16.msra.mxu0 %v3959_v6  ;;  %v412_v6 = vld [vmem:[#allocation7 + $0xb0] sm:$0xff] }
  0x94   :  { %3474 = vmatprep.subr.bf16.mxu0 %v3960_v7  ;;  %3503 = vmatpush3.bf16.msra.mxu1 %v3974_v20  ;;  %v396_v20 = vld [vmem:[#allocation7 + $0x30] sm:$0xff] }
  0x95   :  { %3504 = vmatprep.subr.bf16.mxu1 %v3975_v21 }
  0x97   :  { %3475 = vmatpush3.bf16.msra.mxu0 %v3960_v7 }
  0x98   :  { %3476 = vmatprep.subr.bf16.mxu0 %v3961_v8  ;;  %3505 = vmatpush3.bf16.msra.mxu1 %v3975_v21 }
  0x99   :  { %3506 = vmatprep.subr.bf16.mxu1 %v3976_v22 }
  0x9b   :  { %3477 = vmatpush3.bf16.msra.mxu0 %v3961_v8 }
  0x9c   :  { %3507 = vmatpush3.bf16.msra.mxu1 %v3976_v22 }
  0x9d   :  { %3508 = vmatprep.subr.bf16.mxu1 %v3977_v23 }
  0x9e   :  { %3479 = vmatmul.mubr.bf16.vlgmr.msra.gmra.mrb[0].mxu0 %v3963_v9  ;;  %v394_v9 = vld [vmem:[#allocation7 + $0x20] sm:$0xff] }
  0x9f   :  { %3482 = vmatprep.mubr.bf16.mxu0 %v3964_v10  ;;  %v410_v10 = vld [vmem:[#allocation7 + $0xa0] sm:$0xff] }
  0xa0   :  { %3509 = vmatpush3.bf16.msra.mxu1 %v3977_v23 }
  0xa1   :  { %3558 = vmatprep.subr.bf16.mxu1 %v3994_v33 }
  0xa3   :  { %3511 = vmatmul.mubr.bf16.vlgmr.msra.gmra.mrb[0].mxu1 %v3979_v25 }
  0xa4   :  { %3514 = vmatprep.mubr.bf16.mxu1 %v3982_v27  ;;  %3559 = vmatpush3.bf16.msra.mxu1 %v3994_v33 }
  0xa5   :  { %3560 = vmatprep.subr.bf16.mxu1 %v3995_v34 }
  0xa6   :  { %3483 = vmatmul.mubr.bf16.gmra.mrb[4].mxu0 %v3965_v11 }
  0xa7   :  { %3486 = vmatprep.mubr.bf16.mxu0 %v3966_v12  ;;  %v413_v12 = vld [vmem:[#allocation7 + $0xb8] sm:$0xff] }
  0xa8   :  { %3561 = vmatpush3.bf16.msra.mxu1 %v3995_v34  ;;  %v416_v34 = vld [vmem:[#allocation7 + $0xd0] sm:$0xff] }
  0xa9   :  { %3562 = vmatprep.subr.bf16.mxu1 %v3996_v35 }
  0xab   :  { %3515 = vmatmul.mubr.bf16.gmra.mrb[4].mxu1 %v3983_v28 }
  0xac   :  { %3518 = vmatprep.mubr.bf16.mxu1 %v3986_v29  ;;  %3563 = vmatpush3.bf16.msra.mxu1 %v3996_v35 }
  0xad   :  { %3564 = vmatprep.subr.bf16.mxu1 %v3997_v36 }
  0xae   :  { %3487 = vmatmul.mubr.bf16.gmra.mrb[8].mxu0 %v3967_v13 }
  0xaf   :  { %3490 = vmatprep.mubr.bf16.mxu0 %v3968_v14 }
  0xb0   :  { %3565 = vmatpush3.bf16.msra.mxu1 %v3997_v36 }
  0xb1   :  { %3566 = vmatprep.subr.bf16.mxu1 %v3998_v37 }
  0xb3   :  { %3519 = vmatmul.mubr.bf16.gmra.mrb[8].mxu1 %v3987_v30 }
  0xb4   :  { %3522 = vmatprep.mubr.bf16.mxu1 %v3990_v31  ;;  %3567 = vmatpush3.bf16.msra.mxu1 %v3998_v37  ;;  %v398_v37 = vld [vmem:[#allocation7 + $0x40] sm:$0xff] }
  0xb5   :  { %3568 = vmatprep.subr.bf16.mxu1 %v3999_v38 }
  0xb6   :  { %3491 = vmatmul.mubr.bf16.gmra.mrb[12].mxu0 %v3969_v15  ;;  %v397_v15 = vld [vmem:[#allocation7 + $0x38] sm:$0xff] }
  0xb7   :  { %3542 = vmatprep.mubr.bf16.mxu0 %v3980_v26 }
  0xb8   :  { %3569 = vmatpush3.bf16.msra.mxu1 %v3999_v38  ;;  %v414_v38 = vld [vmem:[#allocation7 + $0xc0] sm:$0xff] }
  0xb9   :  { %3570 = vmatprep.subr.bf16.mxu1 %v4000_v39 }
  0xbb   :  { %3523 = vmatmul.mubr.bf16.gmra.mrb[12].mxu1 %v3991_v32 }
  0xbc   :  { %3571 = vmatpush3.bf16.msra.mxu1 %v4000_v39 }
 0x171   :  { %v3480_v41 = vpop.f32.mrb[0].mxu0 }
 0x172   :  { %v336_v42 = vadd.f32 %v3480_v41, %v4409_v40  ;;  %v327_v44 = vpop.f32.mrb[1].mxu0  ;;  %v417_v41 = vld [vmem:[#allocation7 + $0xd8] sm:$0xff] }
 0x173   :  { %v328_v45 = vadd.f32 %v4409_v40, %v327_v44  ;;  %v3481_v48 = vpop.f32.mrb[2].mxu0  ;;  %v401_v44 = vld [vmem:[#allocation7 + $0x58] sm:$0xff] }
 0x174   :  { %v339_v50 = vadd.f32 %v3481_v48, %v4409_v40  ;;  %v330_v52 = vpop.f32.mrb[3].mxu0  ;;  %v4415_v57 = vmul.f32 %v408_v43, %v336_v42  ;;  %v4431_v1 = vmul.f32 %v392_v56, %v336_v42 }
 0x175   :  { %v331_v55 = vadd.f32 %v4409_v40, %v330_v52  ;;  %v4417_v58 = vmul.f32 %v390_v46, %v328_v45  ;;  %v4421_v60 = vmul.f32 %v406_v47, %v328_v45  ;;  %v399_v46 = vld [vmem:[#allocation7 + $0x48] sm:$0xff] }
 0x176   :  { %5052 = vst [vmem:[#allocation20_spill] sm:$0xff] %v4415_v57  ;;  %v4419_v59 = vmul.f32 %v409_v49, %v339_v50  ;;  %v4423_v61 = vmul.f32 %v393_v51, %v339_v50  ;;  %v415_v47 = vld [vmem:[#allocation7 + $0xc8] sm:$0xff]  ;;  %v400_v49 = vld [vmem:[#allocation7 + $0x50] sm:$0xff] }
 0x177   :  { %5054 = vst [vmem:[#allocation22_spill] sm:$0xff] %v4421_v60  ;;  %v4425_v62 = vmul.f32 %v391_v53, %v331_v55  ;;  %v4427_v63 = vmul.f32 %v407_v54, %v331_v55  ;;  %v702_v57 = vld [vmem:[#allocation8 + $0x70] sm:$0xff]  ;;  %v703_v60 = vld [vmem:[#allocation8 + $0x78] sm:$0xff] }
 0x178   :  { %5053 = vst [vmem:[#allocation21_spill] sm:$0xff] %v4419_v59  ;;  %v753_v13 = vpack.c.bf16 %v4423_v61, %v4431_v1  ;;  %v700_v59 = vld [vmem:[#allocation8 + $0x60] sm:$0xff] }
 0x179   :  { %5055 = vst [vmem:[#allocation23_spill] sm:$0xff] %v4427_v63  ;;  %v3484_v2 = vpop.f32.mrb[4].mxu0  ;;  %v752_v3 = vpack.c.bf16 %v4425_v62, %v4417_v58 }
 0x17a   :  { %v352_v5 = vadd.f32 %v3484_v2, %v4409_v40  ;;  %v343_v7 = vpop.f32.mrb[5].mxu0 }
 0x17b   :  { %v344_v8 = vadd.f32 %v4409_v40, %v343_v7  ;;  %v3485_v11 = vpop.f32.mrb[6].mxu0  ;;  %3526 = vmatprep.subr.bf16.mxu0 %v752_v3 }
 0x17c   :  { %v355_v14 = vadd.f32 %v3485_v11, %v4409_v40  ;;  %v346_v16 = vpop.f32.mrb[7].mxu0  ;;  %3527 = vmatpush3.bf16.msra.mxu0 %v752_v3  ;;  %v4443_v21 = vmul.f32 %v412_v6, %v352_v5  ;;  %v4459_v29 = vmul.f32 %v396_v20, %v352_v5  ;;  %v403_v20 = vld [vmem:[#allocation7 + $0x68] sm:$0xff] }
 0x17d   :  { %v347_v19 = vadd.f32 %v4409_v40, %v346_v16  ;;  %3528 = vmatprep.subr.bf16.mxu0 %v753_v13  ;;  %v4445_v22 = vmul.f32 %v394_v9, %v344_v8  ;;  %v4449_v24 = vmul.f32 %v410_v10, %v344_v8  ;;  %v420_v9 = vld [vmem:[#allocation7 + $0xf0] sm:$0xff] }
 0x17e   :  { %5056 = vst [vmem:[#allocation24_spill] sm:$0xff] %v4443_v21  ;;  %v4447_v23 = vmul.f32 %v413_v12, %v355_v14  ;;  %v4451_v25 = vmul.f32 %v397_v15, %v355_v14  ;;  %v402_v12 = vld [vmem:[#allocation7 + $0x60] sm:$0xff]  ;;  %v421_v15 = vld [vmem:[#allocation7 + $0xf8] sm:$0xff] }
 0x17f   :  { %5058 = vst [vmem:[#allocation26_spill] sm:$0xff] %v4449_v24  ;;  %v4453_v26 = vmul.f32 %v395_v17, %v347_v19  ;;  %v4455_v27 = vmul.f32 %v411_v18, %v347_v19  ;;  %v405_v18 = vld [vmem:[#allocation7 + $0x78] sm:$0xff] }
 0x180   :  { %5057 = vst [vmem:[#allocation25_spill] sm:$0xff] %v4447_v23  ;;  %3529 = vmatpush3.bf16.msra.mxu0 %v753_v13  ;;  %v755_v42 = vpack.c.bf16 %v4451_v25, %v4459_v29  ;;  %v418_v13 = vld [vmem:[#allocation7 + $0xe0] sm:$0xff] }
 0x181   :  { %5059 = vst [vmem:[#allocation27_spill] sm:$0xff] %v4455_v27  ;;  %v3488_v30 = vpop.f32.mrb[8].mxu0  ;;  %v754_v31 = vpack.c.bf16 %v4453_v26, %v4445_v22 }
 0x182   :  { %v368_v33 = vadd.f32 %v3488_v30, %v4409_v40  ;;  %v359_v35 = vpop.f32.mrb[9].mxu0  ;;  %v419_v30 = vld [vmem:[#allocation7 + $0xe8] sm:$0xff] }
 0x183   :  { %v360_v36 = vadd.f32 %v4409_v40, %v359_v35  ;;  %v3489_v39 = vpop.f32.mrb[10].mxu0  ;;  %3530 = vmatprep.subr.bf16.mxu0 %v754_v31 }
 0x184   :  { %v371_v43 = vadd.f32 %v3489_v39, %v4409_v40  ;;  %v362_v45 = vpop.f32.mrb[11].mxu0  ;;  %3531 = vmatpush3.bf16.msra.mxu0 %v754_v31  ;;  %v4471_v50 = vmul.f32 %v416_v34, %v368_v33  ;;  %v4487_v3 = vmul.f32 %v400_v49, %v368_v33  ;;  %v404_v33 = vld [vmem:[#allocation7 + $0x70] sm:$0xff]  ;;  %v3988_v49 = vld [vmem:[#allocation10 + $0x20] sm:$0xff]  }
 0x185   :  { %v363_v48 = vadd.f32 %v4409_v40, %v362_v45  ;;  %3532 = vmatprep.subr.bf16.mxu0 %v755_v42  ;;  %v4473_v51 = vmul.f32 %v398_v37, %v360_v36  ;;  %v4477_v53 = vmul.f32 %v414_v38, %v360_v36 }
 0x186   :  { %5060 = vst [vmem:[#allocation28_spill] sm:$0xff] %v4471_v50  ;;  %v4475_v52 = vmul.f32 %v417_v41, %v371_v43  ;;  %v4479_v54 = vmul.f32 %v401_v44, %v371_v43  ;;  %v694_v44 = vld [vmem:[#allocation8 + $0x30] sm:$0xff]  ;;  %v696_v50 = vld [vmem:[#allocation8 + $0x40] sm:$0xff] }
 0x187   :  { %5061 = vst [vmem:[#allocation29_spill] sm:$0xff] %v4473_v51  ;;  %5063 = vst [vmem:[#allocation31_spill] sm:$0xff] %v4477_v53  ;;  %v4481_v55 = vmul.f32 %v399_v46, %v363_v48  ;;  %v4483_v56 = vmul.f32 %v415_v47, %v363_v48  ;;  %v3981_v46 = vld [vmem:[#allocation10 + $0x8] sm:$0xff]   ;;  %v3984_v47 = vld [vmem:[#allocation10 + $0x10] sm:$0xff]  }
 0x188   :  { %5062 = vst [vmem:[#allocation30_spill] sm:$0xff] %v4475_v52  ;;  %3533 = vmatpush3.bf16.msra.mxu0 %v755_v42  ;;  %v757_v16 = vpack.c.bf16 %v4479_v54, %v4487_v3  ;;  %v3985_v48 = vld [vmem:[#allocation10 + $0x18] sm:$0xff]  }
 0x189   :  { %5064 = vst [vmem:[#allocation32_spill] sm:$0xff] %v4481_v55  ;;  %5065 = vst [vmem:[#allocation33_spill] sm:$0xff] %v4483_v56  ;;  %v3492_v5 = vpop.f32.mrb[12].mxu0  ;;  %v756_v6 = vpack.c.bf16 %v4481_v55, %v4473_v51 }
 0x18a   :  { %v384_v8 = vadd.f32 %v3492_v5, %v4409_v40  ;;  %v375_v10 = vpop.f32.mrb[13].mxu0  ;;  %v3989_v5 = vld [vmem:[#allocation10 + $0x28] sm:$0xff]  }
 0x18b   :  { %v376_v11 = vadd.f32 %v4409_v40, %v375_v10  ;;  %v3493_v14 = vpop.f32.mrb[14].mxu0  ;;  %3534 = vmatprep.subr.bf16.mxu0 %v756_v6  ;;  %v3512_v10 = vpop.f32.mrb[0].mxu1 }
 0x18c   :  { %v387_v17 = vadd.f32 %v3493_v14, %v4409_v40  ;;  %v378_v19 = vpop.f32.mrb[15].mxu0  ;;  %3535 = vmatpush3.bf16.msra.mxu0 %v756_v6  ;;  %v4499_v34 = vmul.f32 %v420_v9, %v384_v8  ;;  %v4515_v42 = vmul.f32 %v404_v33, %v384_v8  ;;  %v3992_v6 = vld [vmem:[#allocation10 + $0x30] sm:$0xff]   ;;  %v3993_v8 = vld [vmem:[#allocation10 + $0x38] sm:$0xff]   ;;  %v4526_v9 = vld [vmem:[%s5028_s7 + $0x1] ss:$0 sm:$0xff] }
 0x18d   :  { %v379_v31 = vadd.f32 %v4409_v40, %v378_v19  ;;  %3536 = vmatprep.subr.bf16.mxu0 %v757_v16  ;;  %v4501_v35 = vmul.f32 %v402_v12, %v376_v11  ;;  %v4505_v37 = vmul.f32 %v418_v13, %v376_v11  ;;  %v634_v11 = vadd.f32 %v3512_v10, %v4526_v9  ;;  %v706_v12 = vld [vmem:[#allocation8 + $0x90] sm:$0xff]  ;;  %v625_v13 = vpop.f32.mrb[1].mxu1  ;;  %v4001_v10 = vld [vmem:[#allocation13 + $0xb8] sm:$0xff]   ;;  %v709_v40 = vld [vmem:[#allocation8 + $0xa8] sm:$0xff] }
 0x18e   :  { %5066 = vst [vmem:[#allocation34_spill] sm:$0xff] %v4499_v34  ;;  %v4503_v36 = vmul.f32 %v421_v15, %v387_v17  ;;  %v4507_v38 = vmul.f32 %v405_v18, %v387_v17  ;;  %5073 = vst [vmem:[#allocation41_spill] sm:$0xff] %v4515_v42  ;;  %v626_v14 = vadd.f32 %v4526_v9, %v625_v13  ;;  %v704_v15 = vld [vmem:[#allocation8 + $0x80] sm:$0xff]  ;;  %v707_v17 = vld [vmem:[#allocation8 + $0x98] sm:$0xff]  ;;  %3572 = vmatprep.subr.bf16.mxu1 %v4001_v10 }
 0x18f   :  { %5067 = vst [vmem:[#allocation35_spill] sm:$0xff] %v4501_v35  ;;  %5069 = vst [vmem:[#allocation37_spill] sm:$0xff] %v4505_v37  ;;  %v4509_v39 = vmul.f32 %v403_v20, %v379_v31  ;;  %v4511_v41 = vmul.f32 %v419_v30, %v379_v31  ;;  %v690_v18 = vld [vmem:[#allocation8 + $0x10] sm:$0xff]  ;;  %v705_v30 = vld [vmem:[#allocation8 + $0x88] sm:$0xff]  ;;  %v4532_v33 = vmul.f32 %v706_v12, %v634_v11  ;;  %3573 = vmatpush3.bf16.msra.mxu1 %v4001_v10 }
 0x190   :  { %5068 = vst [vmem:[#allocation36_spill] sm:$0xff] %v4503_v36  ;;  %5070 = vst [vmem:[#allocation38_spill] sm:$0xff] %v4507_v38  ;;  %3537 = vmatpush3.bf16.msra.mxu0 %v757_v16  ;;  %v759_v45 = vpack.c.bf16 %v4507_v38, %v4515_v42  ;;  %v3513_v16 = vpop.f32.mrb[2].mxu1  ;;  %v715_v36 = vld [vmem:[#allocation8 + $0xd8] sm:$0xff] }
 0x191   :  { %5071 = vst [vmem:[#allocation39_spill] sm:$0xff] %v4509_v39  ;;  %5072 = vst [vmem:[#allocation40_spill] sm:$0xff] %v4511_v41  ;;  %v758_v43 = vpack.c.bf16 %v4509_v39, %v4501_v35  ;;  %v637_v19 = vadd.f32 %v3513_v16, %v4526_v9  ;;  %v628_v20 = vpop.f32.mrb[3].mxu1 }
 0x192   :  { %v629_v31 = vadd.f32 %v4526_v9, %v628_v20  ;;  %v3516_v12 = vpop.f32.mrb[4].mxu1 }
 0x193   :  { %3538 = vmatprep.subr.bf16.mxu0 %v758_v43  ;;  %v641_v16 = vpop.f32.mrb[5].mxu1 }
 0x194   :  { %3539 = vmatpush3.bf16.msra.mxu0 %v758_v43  ;;  %v4534_v43 = vmul.f32 %v704_v15, %v626_v14  ;;  %v3517_v20 = vpop.f32.mrb[6].mxu1 }
 0x195   :  { %3540 = vmatprep.subr.bf16.mxu0 %v759_v45 }
 0x198   :  { %3541 = vmatpush3.bf16.msra.mxu0 %v759_v45  ;;  %v4536_v45 = vmul.f32 %v707_v17, %v637_v19 }
 0x19b   :  { %3543 = vmatmul.mubr.bf16.vlgmr.msra.gmra.mrb[16].mxu0 %v3981_v46  ;;  %v4538_v46 = vmul.f32 %v690_v18, %v634_v11  ;;  %v650_v11 = vadd.f32 %v3516_v12, %v4526_v9  ;;  %v711_v12 = vld [vmem:[#allocation8 + $0xb8] sm:$0xff] }
 0x19c   :  { %3546 = vmatprep.mubr.bf16.mxu0 %v3984_v47  ;;  %v688_v47 = vld [vmem:[#allocation8] sm:$0xff] }
 0x19d   :  { %v4573_v32 = vmul.f32 %v694_v44, %v650_v11  ;;  %v713_v44 = vld [vmem:[#allocation8 + $0xc8] sm:$0xff] }
 0x1a3   :  { %3547 = vmatmul.mubr.bf16.gmra.mrb[20].mxu0 %v3985_v48  ;;  %v691_v48 = vld [vmem:[#allocation8 + $0x18] sm:$0xff] }
 0x1a4   :  { %3550 = vmatprep.mubr.bf16.mxu0 %v3988_v49  ;;  %v689_v49 = vld [vmem:[#allocation8 + $0x8] sm:$0xff] }
 0x1a5   :  { %v4546_v13 = vmul.f32 %v689_v49, %v629_v31 }
 0x1ab   :  { %3551 = vmatmul.mubr.bf16.gmra.mrb[24].mxu0 %v3989_v5  ;;  %v4540_v5 = vmul.f32 %v705_v30, %v629_v31  ;;  %v644_v30 = vpop.f32.mrb[7].mxu1  ;;  %v642_v31 = vadd.f32 %v4526_v9, %v641_v16  ;;  %v695_v16 = vld [vmem:[#allocation8 + $0x38] sm:$0xff] }
 0x1ac   :  { %3554 = vmatprep.mubr.bf16.mxu0 %v3992_v6  ;;  %v4542_v6 = vmul.f32 %v688_v47, %v626_v14  ;;  %v708_v47 = vld [vmem:[#allocation8 + $0xa0] sm:$0xff]  ;;  %v645_v49 = vadd.f32 %v4526_v9, %v644_v30  ;;  %v3520_v30 = vpop.f32.mrb[8].mxu1 }
 0x1ad   :  { %v4567_v2 = vmul.f32 %v708_v47, %v642_v31  ;;  %v4575_v18 = vmul.f32 %v692_v0, %v642_v31  ;;  %v714_v31 = vld [vmem:[#allocation8 + $0xd0] sm:$0xff] }
 0x1ae   :  { %v4550_v15 = vpack.c.bf16 %v4546_v13, %v4542_v6  ;;  %v4571_v28 = vmul.f32 %v709_v40, %v645_v49  ;;  %v698_v0 = vld [vmem:[#allocation8 + $0x50] sm:$0xff] }
 0x1b0   :  { %3654 = vmatprep.subr.bf16.mxu1 %v4550_v15 }
 0x1b3   :  { %3555 = vmatmul.mubr.bf16.gmra.mrb[28].mxu0 %v3993_v8  ;;  %v4544_v8 = vmul.f32 %v691_v48, %v637_v19  ;;  %v710_v19 = vld [vmem:[#allocation8 + $0xb0] sm:$0xff]  ;;  %v653_v48 = vadd.f32 %v3517_v20, %v4526_v9 }
 0x1b4   :  { %v4565_v10 = vmul.f32 %v710_v19, %v650_v11  ;;  %v4579_v19 = vmul.f32 %v693_v4, %v645_v49  ;;  %v666_v11 = vadd.f32 %v3520_v30, %v4526_v9  ;;  %v657_v4 = vpop.f32.mrb[9].mxu1  ;;  %v699_v30 = vld [vmem:[#allocation8 + $0x58] sm:$0xff] }
 0x1b5   :  { %v4555_v17 = vpack.c.bf16 %v4544_v8, %v4538_v46  ;;  %v4569_v7 = vmul.f32 %v711_v12, %v653_v48  ;;  %v4577_v20 = vmul.f32 %v695_v16, %v653_v48  ;;  %v3521_v48 = vpop.f32.mrb[10].mxu1  ;;  %v658_v49 = vadd.f32 %v4526_v9, %v657_v4  ;;  %v712_v12 = vld [vmem:[#allocation8 + $0xc0] sm:$0xff] }
 0x1b6   :  { %v4583_v47 = vpack.c.bf16 %v4579_v19, %v4575_v18  ;;  %v660_v16 = vpop.f32.mrb[11].mxu1  ;;  %v4595_v14 = vmul.f32 %v714_v31, %v666_v11  ;;  %v669_v34 = vadd.f32 %v3521_v48, %v4526_v9  ;;  %v4605_v4 = vmul.f32 %v698_v0, %v666_v11  ;;  %v697_v31 = vld [vmem:[#allocation8 + $0x48] sm:$0xff]  ;;  %v716_v11 = vld [vmem:[#allocation8 + $0xe0] sm:$0xff] }
 0x1b7   :  { %v4587_v40 = vpack.c.bf16 %v4577_v20, %v4573_v32  ;;  %v661_v37 = vadd.f32 %v4526_v9, %v660_v16  ;;  %v4599_v41 = vmul.f32 %v712_v12, %v658_v49  ;;  %v4607_v56 = vmul.f32 %v696_v50, %v658_v49  ;;  %v3524_v16 = vpop.f32.mrb[12].mxu1  ;;  %v717_v12 = vld [vmem:[#allocation8 + $0xe8] sm:$0xff] }
 0x1b8   :  { %v4601_v52 = vmul.f32 %v715_v36, %v669_v34  ;;  %v4609_v21 = vmul.f32 %v699_v30, %v669_v34  ;;  %v682_v36 = vadd.f32 %v3524_v16, %v4526_v9  ;;  %v673_v24 = vpop.f32.mrb[13].mxu1  ;;  %v719_v16 = vld [vmem:[#allocation8 + $0xf8] sm:$0xff] }
 0x1b9   :  { %v4603_v53 = vmul.f32 %v713_v44, %v661_v37  ;;  %v4611_v48 = vmul.f32 %v697_v31, %v661_v37  ;;  %v718_v44 = vld [vmem:[#allocation8 + $0xf0] sm:$0xff]  ;;  %v3525_v37 = vpop.f32.mrb[14].mxu1  ;;  %v674_v0 = vadd.f32 %v4526_v9, %v673_v24 }
 0x1ba   :  { %v4624_v34 = vpack.c.bf16 %v4609_v21, %v4605_v4  ;;  %v676_v49 = vpop.f32.mrb[15].mxu1  ;;  %v4627_v30 = vmul.f32 %v718_v44, %v682_v36  ;;  %v685_v31 = vadd.f32 %v3525_v37, %v4526_v9  ;;  %v4637_v24 = vmul.f32 %v702_v57, %v682_v36  ;;  %v701_v44 = vld [vmem:[#allocation8 + $0x68] sm:$0xff]  ;;  %v4014_v36 = vld [vmem:[#allocation13 + $0xe0] sm:$0xff]  }
 0x1bb   :  { %v4620_v50 = vpack.c.bf16 %v4611_v48, %v4607_v56  ;;  %v677_v23 = vadd.f32 %v4526_v9, %v676_v49  ;;  %v4631_v27 = vmul.f32 %v716_v11, %v674_v0  ;;  %v4639_v35 = vmul.f32 %v700_v59, %v674_v0  ;;  %v4010_v59 = vld [vmem:[#allocation13 + $0xc0] sm:$0xff]   ;;  %v4015_v0 = vld [vmem:[#allocation13 + $0xe8] sm:$0xff]  }
 0x1bc   :  { %v4633_v63 = vmul.f32 %v719_v16, %v685_v31  ;;  %v4641_v38 = vmul.f32 %v703_v60, %v685_v31  ;;  %3606 = vmatprep.subr.bf16.mxu0 %v4010_v59  ;;  %v4012_v60 = vld [vmem:[#allocation13 + $0xd0] sm:$0xff]  }
 0x1bd   :  { %v4635_v39 = vmul.f32 %v717_v12, %v677_v23  ;;  %v4643_v37 = vmul.f32 %v701_v44, %v677_v23  ;;  %v4011_v12 = vld [vmem:[#allocation13 + $0xc8] sm:$0xff]   ;;  %3607 = vmatpush3.bf16.msra.mxu0 %v4010_v59  ;;  %v4013_v23 = vld [vmem:[#allocation13 + $0xd8] sm:$0xff]  }
 0x1be   :  { %v4655_v57 = vpack.c.bf16 %v4641_v38, %v4637_v24  ;;  %3608 = vmatprep.subr.bf16.mxu0 %v4011_v12 }
 0x1bf   :  { %v4651_v49 = vpack.c.bf16 %v4643_v37, %v4639_v35 }
 0x1c1   :  { %3609 = vmatpush3.bf16.msra.mxu0 %v4011_v12 }
 0x1c2   :  { %3610 = vmatprep.subr.bf16.mxu0 %v4012_v60 }
 0x1c5   :  { %3611 = vmatpush3.bf16.msra.mxu0 %v4012_v60 }
 0x1c6   :  { %3612 = vmatprep.subr.bf16.mxu0 %v4013_v23 }
 0x1c9   :  { %3613 = vmatpush3.bf16.msra.mxu0 %v4013_v23 }
 0x1ca   :  { %3614 = vmatprep.subr.bf16.mxu0 %v4014_v36 }
 0x1cd   :  { %3615 = vmatpush3.bf16.msra.mxu0 %v4014_v36 }
 0x1ce   :  { %3616 = vmatprep.subr.bf16.mxu0 %v4015_v0 }
 0x1d1   :  { %3617 = vmatpush3.bf16.msra.mxu0 %v4015_v0 }
 0x26e   :  { %v3544_v31 = vpop.f32.mrb[16].mxu0 }
 0x26f   :  { %v907_v16 = vadd.f32 %v3544_v31, %v4538_v46  ;;  %v842_v44 = vpop.f32.mrb[17].mxu0 }
 0x270   :  { %v3545_v11 = vpop.f32.mrb[18].mxu0  ;;  %v905_v12 = vadd.f32 %v842_v44, %v4542_v6 }
 0x271   :  { %v908_v59 = vadd.f32 %v3545_v11, %v4544_v8  ;;  %v845_v9 = vpop.f32.mrb[19].mxu0 }
 0x272   :  { %v906_v60 = vadd.f32 %v845_v9, %v4546_v13 }
 0x273   :  { %v922_v42 = vpack.c.bf16 %v908_v59, %v907_v16 }
 0x274   :  { %v921_v55 = vpack.c.bf16 %v906_v60, %v905_v12 }
 0x276   :  { %v3548_v23 = vpop.f32.mrb[20].mxu0  ;;  %3574 = vmatprep.mubr.bf16.mxu1 %v921_v55 }
 0x277   :  { %v911_v36 = vadd.f32 %v3548_v23, %v4573_v32  ;;  %v858_v51 = vpop.f32.mrb[21].mxu0  ;;  %3575 = vmatmul.mubr.bf16.vlgmr.msra.gmra.mrb[16].mxu1 %v922_v42 }
 0x278   :  { %v909_v0 = vadd.f32 %v858_v51, %v4575_v18  ;;  %3655 = vmatpush3.bf16.msra.mxu1 %v4550_v15  ;;  %v3549_v46 = vpop.f32.mrb[22].mxu0 }
 0x279   :  { %v912_v8 = vadd.f32 %v3549_v46, %v4577_v20  ;;  %3656 = vmatprep.subr.bf16.mxu1 %v4555_v17  ;;  %v861_v6 = vpop.f32.mrb[23].mxu0 }
 0x27a   :  { %v910_v13 = vadd.f32 %v861_v6, %v4579_v19 }
 0x27b   :  { %v924_v9 = vpack.c.bf16 %v912_v8, %v911_v36 }
 0x27c   :  { %v923_v11 = vpack.c.bf16 %v910_v13, %v909_v0  ;;  %3657 = vmatpush3.bf16.msra.mxu1 %v4555_v17 }
 0x27d   :  { %3658 = vmatprep.subr.bf16.mxu1 %v4583_v47 }
 0x27e   :  { %v3552_v32 = vpop.f32.mrb[24].mxu0  ;;  %3578 = vmatprep.mubr.bf16.mxu1 %v923_v11 }
 0x27f   :  { %v915_v51 = vadd.f32 %v3552_v32, %v4605_v4  ;;  %v874_v55 = vpop.f32.mrb[25].mxu0  ;;  %3579 = vmatmul.mubr.bf16.gmra.mrb[20].mxu1 %v924_v9 }
 0x280   :  { %v913_v42 = vadd.f32 %v874_v55, %v4607_v56  ;;  %3659 = vmatpush3.bf16.msra.mxu1 %v4583_v47  ;;  %v3553_v15 = vpop.f32.mrb[26].mxu0 }
 0x281   :  { %v916_v18 = vadd.f32 %v3553_v15, %v4609_v21  ;;  %3660 = vmatprep.subr.bf16.mxu1 %v4587_v40  ;;  %v877_v20 = vpop.f32.mrb[27].mxu0 }
 0x282   :  { %v914_v17 = vadd.f32 %v877_v20, %v4611_v48 }
 0x283   :  { %v926_v19 = vpack.c.bf16 %v916_v18, %v915_v51 }
 0x284   :  { %v925_v31 = vpack.c.bf16 %v914_v17, %v913_v42  ;;  %3661 = vmatpush3.bf16.msra.mxu1 %v4587_v40  ;;  %v4019_v42 = vld [vmem:[#allocation13 + $0x108] sm:$0xff]  }
 0x285   :  { %3662 = vmatprep.subr.bf16.mxu1 %v4620_v50 }
 0x286   :  { %v3556_v4 = vpop.f32.mrb[28].mxu0  ;;  %3582 = vmatprep.mubr.bf16.mxu1 %v925_v31 }
 0x287   :  { %v919_v56 = vadd.f32 %v3556_v4, %v4637_v24  ;;  %v890_v16 = vpop.f32.mrb[29].mxu0  ;;  %3583 = vmatmul.mubr.bf16.gmra.mrb[24].mxu1 %v926_v19 }
 0x288   :  { %v917_v47 = vadd.f32 %v890_v16, %v4639_v35  ;;  %3663 = vmatpush3.bf16.msra.mxu1 %v4620_v50  ;;  %v3557_v21 = vpop.f32.mrb[30].mxu0  ;;  %v5074_v35 = vpack.c.bf16 %v4540_v5, %v4534_v43  ;;  %v5076_v50 = vpack.c.bf16 %v4571_v28, %v4567_v2  ;;  %v5078_v43 = vpack.c.bf16 %v4603_v53, %v4599_v41  ;;  %v4715_v2 = vld [vmem:[#allocation11 + $0x8] sm:$0xff]   ;;  %v4717_v53 = vld [vmem:[#allocation11 + $0x10] sm:$0xff]  }
 0x289   :  { %v920_v44 = vadd.f32 %v3557_v21, %v4641_v38  ;;  %3664 = vmatprep.subr.bf16.mxu1 %v4624_v34  ;;  %v893_v48 = vpop.f32.mrb[31].mxu0  ;;  %v5075_v38 = vpack.c.bf16 %v4536_v45, %v4532_v33  ;;  %v5079_v5 = vpack.c.bf16 %v4601_v52, %v4595_v14  ;;  %v5080_v33 = vpack.c.bf16 %v4635_v39, %v4631_v27  ;;  %v4709_v45 = vld [vmem:[#allocation11] sm:$0xff]   ;;  %v4721_v52 = vld [vmem:[#allocation11 + $0x18] sm:$0xff]   ;;  %v4016_v41 = vld [vmem:[#allocation13 + $0xf0] sm:$0xff]  }
 0x28a   :  { %v918_v40 = vadd.f32 %v893_v48, %v4643_v37  ;;  %v5081_v28 = vpack.c.bf16 %v4633_v63, %v4627_v30  ;;  %v4723_v27 = vld [vmem:[#allocation11 + $0x20] sm:$0xff]   ;;  %v4727_v63 = vld [vmem:[#allocation11 + $0x28] sm:$0xff]   ;;  %v4733_v39 = vld [vmem:[#allocation11 + $0x38] sm:$0xff]   ;;  %3618 = vmatprep.subr.bf16.mxu0 %v4016_v41 }
 0x28b   :  { %v928_v59 = vpack.c.bf16 %v920_v44, %v919_v56  ;;  %3619 = vmatpush3.bf16.msra.mxu0 %v4016_v41  ;;  %v4017_v14 = vld [vmem:[#allocation13 + $0xf8] sm:$0xff]   ;;  %v4739_v30 = vld [vmem:[%s5028_s7 + $0x2] ss:$0 sm:$0xff]  ;;  %v4020_v56 = vld [vmem:[#allocation13 + $0x110] sm:$0xff]  }
 0x28c   :  { %v927_v12 = vpack.c.bf16 %v918_v40, %v917_v47  ;;  %3665 = vmatpush3.bf16.msra.mxu1 %v4624_v34  ;;  %v5077_v34 = vpack.c.bf16 %v4569_v7, %v4565_v10  ;;  %v4729_v7 = vld [vmem:[#allocation11 + $0x30] sm:$0xff]   ;;  %3620 = vmatprep.subr.bf16.mxu0 %v4017_v14  ;;  %v4018_v10 = vld [vmem:[#allocation13 + $0x100] sm:$0xff]  }
 0x28d   :  { %3666 = vmatprep.subr.bf16.mxu1 %v4651_v49 }
 0x28e   :  { %3586 = vmatprep.mubr.bf16.mxu1 %v927_v12  ;;  %v4021_v12 = vld [vmem:[#allocation13 + $0x118] sm:$0xff]  }
 0x28f   :  { %3587 = vmatmul.mubr.bf16.gmra.mrb[28].mxu1 %v928_v59  ;;  %3621 = vmatpush3.bf16.msra.mxu0 %v4017_v14 }
 0x290   :  { %3667 = vmatpush3.bf16.msra.mxu1 %v4651_v49  ;;  %3590 = vmatprep.mubr.bf16.mxu1 %v5074_v35 }
 0x291   :  { %3668 = vmatprep.subr.bf16.mxu1 %v4655_v57  ;;  %3686 = vmatprep.subr.bf16.mxu0 %v4018_v10 }
 0x294   :  { %3669 = vmatpush3.bf16.msra.mxu1 %v4655_v57 }
 0x297   :  { %3591 = vmatmul.mubr.bf16.gmra.mrb[32].mxu1 %v5075_v38 }
 0x298   :  { %3594 = vmatprep.mubr.bf16.mxu1 %v5076_v50 }
 0x29f   :  { %3595 = vmatmul.mubr.bf16.gmra.mrb[36].mxu1 %v5077_v34 }
 0x2a0   :  { %3598 = vmatprep.mubr.bf16.mxu1 %v5078_v43 }
 0x2a7   :  { %3599 = vmatmul.mubr.bf16.gmra.mrb[40].mxu1 %v5079_v5 }
 0x2a8   :  { %3602 = vmatprep.mubr.bf16.mxu1 %v5080_v33 }
 0x2af   :  { %3603 = vmatmul.mubr.bf16.gmra.mrb[44].mxu1 %v5081_v28  ;;  %v4022_v28 = vld [vmem:[#allocation13 + $0x120] sm:$0xff]  }
 0x2b0   :  { %3670 = vmatprep.mubr.bf16.mxu1 %v4709_v45 }
 0x2b7   :  { %3671 = vmatmul.mubr.bf16.vlgmr.msra.gmra.mrb[48].mxu1 %v4715_v2 }
 0x2b8   :  { %3674 = vmatprep.mubr.bf16.mxu1 %v4717_v53 }
 0x2bf   :  { %3675 = vmatmul.mubr.bf16.gmra.mrb[52].mxu1 %v4721_v52 }
 0x2c0   :  { %3678 = vmatprep.mubr.bf16.mxu1 %v4723_v27 }
 0x2c7   :  { %3679 = vmatmul.mubr.bf16.gmra.mrb[56].mxu1 %v4727_v63 }
 0x2c8   :  { %3682 = vmatprep.mubr.bf16.mxu1 %v4729_v7 }
 0x2cf   :  { %3683 = vmatmul.mubr.bf16.gmra.mrb[60].mxu1 %v4733_v39 }
 0x34a   :  { %v3576_v24 = vpop.f32.mrb[16].mxu1 }
 0x34b   :  { %v1053_v37 = vadd.f32 %v3576_v24, %v4739_v30  ;;  %v1044_v49 = vpop.f32.mrb[17].mxu1 }
 0x34c   :  { %v1045_v57 = vadd.f32 %v4739_v30, %v1044_v49  ;;  %v3577_v60 = vpop.f32.mrb[18].mxu1 }
 0x34d   :  { %v1056_v23 = vadd.f32 %v3577_v60, %v4739_v30  ;;  %v1047_v36 = vpop.f32.mrb[19].mxu1  ;;  %v1173_v46 = vmax.f32 %v1053_v37, 0.0  ;;  %v4023_v60 = vld [vmem:[#allocation13 + $0x128] sm:$0xff]  }
 0x34e   :  { %v1048_v0 = vadd.f32 %v4739_v30, %v1047_v36  ;;  %v1171_v6 = vmax.f32 %v1045_v57, 0.0 }
 0x34f   :  { %v1174_v8 = vmax.f32 %v1056_v23, 0.0 }
 0x350   :  { %v1172_v13 = vmax.f32 %v1048_v0, 0.0 }
 0x351   :  { %v1204_v9 = vpack.c.bf16 %v1174_v8, %v1173_v46 }
 0x352   :  { %v1203_v11 = vpack.c.bf16 %v1172_v13, %v1171_v6  ;;  %v3580_v32 = vpop.f32.mrb[20].mxu1 }
 0x353   :  { %v1069_v51 = vadd.f32 %v3580_v32, %v4739_v30  ;;  %v1060_v55 = vpop.f32.mrb[21].mxu1 }
 0x354   :  { %v1061_v15 = vadd.f32 %v4739_v30, %v1060_v55  ;;  %v3581_v18 = vpop.f32.mrb[22].mxu1  ;;  %3622 = vmatprep.mubr.bf16.mxu0 %v1203_v11 }
 0x355   :  { %v1072_v20 = vadd.f32 %v3581_v18, %v4739_v30  ;;  %v1063_v17 = vpop.f32.mrb[23].mxu1  ;;  %3623 = vmatmul.mubr.bf16.vlgmr.msra.gmra.mrb[32].mxu0 %v1204_v9  ;;  %v1177_v31 = vmax.f32 %v1069_v51, 0.0  ;;  %v4024_v9 = vld [vmem:[#allocation13 + $0x130] sm:$0xff]  }
 0x356   :  { %v1064_v19 = vadd.f32 %v4739_v30, %v1063_v17  ;;  %3687 = vmatpush3.bf16.msra.mxu0 %v4018_v10  ;;  %v1175_v16 = vmax.f32 %v1061_v15, 0.0 }
 0x357   :  { %v1178_v4 = vmax.f32 %v1072_v20, 0.0  ;;  %3688 = vmatprep.subr.bf16.mxu0 %v4019_v42  ;;  %v4025_v20 = vld [vmem:[#allocation13 + $0x138] sm:$0xff]  }
 0x358   :  { %v1176_v47 = vmax.f32 %v1064_v19, 0.0 }
 0x359   :  { %v1206_v21 = vpack.c.bf16 %v1178_v4, %v1177_v31 }
 0x35a   :  { %v1205_v44 = vpack.c.bf16 %v1176_v47, %v1175_v16  ;;  %v3584_v48 = vpop.f32.mrb[24].mxu1  ;;  %3689 = vmatpush3.bf16.msra.mxu0 %v4019_v42 }
 0x35b   :  { %v1085_v40 = vadd.f32 %v3584_v48, %v4739_v30  ;;  %v1076_v59 = vpop.f32.mrb[25].mxu1  ;;  %3690 = vmatprep.subr.bf16.mxu0 %v4020_v56 }
 0x35c   :  { %v1077_v35 = vadd.f32 %v4739_v30, %v1076_v59  ;;  %v3585_v38 = vpop.f32.mrb[26].mxu1  ;;  %3626 = vmatprep.mubr.bf16.mxu0 %v1205_v44 }
 0x35d   :  { %v1088_v50 = vadd.f32 %v3585_v38, %v4739_v30  ;;  %v1079_v34 = vpop.f32.mrb[27].mxu1  ;;  %3627 = vmatmul.mubr.bf16.gmra.mrb[36].mxu0 %v1206_v21  ;;  %v1181_v5 = vmax.f32 %v1085_v40, 0.0 }
 0x35e   :  { %v1080_v43 = vadd.f32 %v4739_v30, %v1079_v34  ;;  %3691 = vmatpush3.bf16.msra.mxu0 %v4020_v56  ;;  %v1179_v41 = vmax.f32 %v1077_v35, 0.0 }
 0x35f   :  { %v1182_v33 = vmax.f32 %v1088_v50, 0.0  ;;  %3692 = vmatprep.subr.bf16.mxu0 %v4021_v12 }
 0x360   :  { %v1180_v14 = vmax.f32 %v1080_v43, 0.0 }
 0x361   :  { %v1208_v10 = vpack.c.bf16 %v1182_v33, %v1181_v5 }
 0x362   :  { %v1207_v24 = vpack.c.bf16 %v1180_v14, %v1179_v41  ;;  %v3588_v37 = vpop.f32.mrb[28].mxu1  ;;  %3693 = vmatpush3.bf16.msra.mxu0 %v4021_v12 }
 0x363   :  { %v1101_v49 = vadd.f32 %v3588_v37, %v4739_v30  ;;  %v1092_v57 = vpop.f32.mrb[29].mxu1  ;;  %3694 = vmatprep.subr.bf16.mxu0 %v4022_v28 }
 0x364   :  { %v1093_v23 = vadd.f32 %v4739_v30, %v1092_v57  ;;  %v3589_v36 = vpop.f32.mrb[30].mxu1  ;;  %3630 = vmatprep.mubr.bf16.mxu0 %v1207_v24 }
 0x365   :  { %v1104_v0 = vadd.f32 %v3589_v36, %v4739_v30  ;;  %v1095_v46 = vpop.f32.mrb[31].mxu1  ;;  %3631 = vmatmul.mubr.bf16.gmra.mrb[40].mxu0 %v1208_v10  ;;  %v1185_v6 = vmax.f32 %v1101_v49, 0.0 }
 0x366   :  { %v1096_v8 = vadd.f32 %v4739_v30, %v1095_v46  ;;  %3695 = vmatpush3.bf16.msra.mxu0 %v4022_v28  ;;  %v1183_v11 = vmax.f32 %v1093_v23, 0.0 }
 0x367   :  { %v1186_v13 = vmax.f32 %v1104_v0, 0.0  ;;  %3696 = vmatprep.subr.bf16.mxu0 %v4023_v60 }
 0x368   :  { %v1184_v32 = vmax.f32 %v1096_v8, 0.0 }
 0x369   :  { %v1210_v51 = vpack.c.bf16 %v1186_v13, %v1185_v6 }
 0x36a   :  { %v1209_v55 = vpack.c.bf16 %v1184_v32, %v1183_v11  ;;  %v3592_v42 = vpop.f32.mrb[32].mxu1  ;;  %3697 = vmatpush3.bf16.msra.mxu0 %v4023_v60 }
 0x36b   :  { %v1117_v15 = vadd.f32 %v3592_v42, %v4739_v30  ;;  %v1108_v18 = vpop.f32.mrb[33].mxu1  ;;  %3698 = vmatprep.subr.bf16.mxu0 %v4024_v9 }
 0x36c   :  { %v1109_v17 = vadd.f32 %v4739_v30, %v1108_v18  ;;  %v3593_v19 = vpop.f32.mrb[34].mxu1  ;;  %3634 = vmatprep.mubr.bf16.mxu0 %v1209_v55 }
 0x36d   :  { %v1120_v31 = vadd.f32 %v3593_v19, %v4739_v30  ;;  %v1111_v4 = vpop.f32.mrb[35].mxu1  ;;  %3635 = vmatmul.mubr.bf16.gmra.mrb[44].mxu0 %v1210_v51  ;;  %v1189_v16 = vmax.f32 %v1117_v15, 0.0 }
 0x36e   :  { %v1112_v56 = vadd.f32 %v4739_v30, %v1111_v4  ;;  %3699 = vmatpush3.bf16.msra.mxu0 %v4024_v9  ;;  %v1187_v21 = vmax.f32 %v1109_v17, 0.0 }
 0x36f   :  { %v1190_v47 = vmax.f32 %v1120_v31, 0.0  ;;  %3700 = vmatprep.subr.bf16.mxu0 %v4025_v20 }
 0x370   :  { %v1188_v44 = vmax.f32 %v1112_v56, 0.0 }
 0x371   :  { %v1212_v48 = vpack.c.bf16 %v1190_v47, %v1189_v16 }
 0x372   :  { %v1211_v40 = vpack.c.bf16 %v1188_v44, %v1187_v21  ;;  %v3596_v59 = vpop.f32.mrb[36].mxu1  ;;  %3701 = vmatpush3.bf16.msra.mxu0 %v4025_v20 }
 0x373   :  { %v1133_v12 = vadd.f32 %v3596_v59, %v4739_v30  ;;  %v1124_v35 = vpop.f32.mrb[37].mxu1 }
 0x374   :  { %v1125_v38 = vadd.f32 %v4739_v30, %v1124_v35  ;;  %v3597_v50 = vpop.f32.mrb[38].mxu1  ;;  %3638 = vmatprep.mubr.bf16.mxu0 %v1211_v40 }
 0x375   :  { %v1136_v34 = vadd.f32 %v3597_v50, %v4739_v30  ;;  %v1127_v43 = vpop.f32.mrb[39].mxu1  ;;  %3639 = vmatmul.mubr.bf16.gmra.mrb[48].mxu0 %v1212_v48  ;;  %v1193_v33 = vmax.f32 %v1133_v12, 0.0 }
 0x376   :  { %v1128_v5 = vadd.f32 %v4739_v30, %v1127_v43  ;;  %v1191_v41 = vmax.f32 %v1125_v38, 0.0 }
 0x377   :  { %v1194_v28 = vmax.f32 %v1136_v34, 0.0 }
 0x378   :  { %v1192_v14 = vmax.f32 %v1128_v5, 0.0 }
 0x379   :  { %v1214_v10 = vpack.c.bf16 %v1194_v28, %v1193_v33 }
 0x37a   :  { %v1213_v24 = vpack.c.bf16 %v1192_v14, %v1191_v41  ;;  %v3600_v37 = vpop.f32.mrb[40].mxu1 }
 0x37b   :  { %v1149_v49 = vadd.f32 %v3600_v37, %v4739_v30  ;;  %v1140_v57 = vpop.f32.mrb[41].mxu1 }
 0x37c   :  { %v1141_v60 = vadd.f32 %v4739_v30, %v1140_v57  ;;  %v3601_v23 = vpop.f32.mrb[42].mxu1  ;;  %3642 = vmatprep.mubr.bf16.mxu0 %v1213_v24 }
 0x37d   :  { %v1152_v36 = vadd.f32 %v3601_v23, %v4739_v30  ;;  %v1143_v0 = vpop.f32.mrb[43].mxu1  ;;  %3643 = vmatmul.mubr.bf16.gmra.mrb[52].mxu0 %v1214_v10  ;;  %v1197_v8 = vmax.f32 %v1149_v49, 0.0  ;;  %v5083_v23 = vld [vmem:[#allocation32_spill] sm:$0xff] }
 0x37e   :  { %v1144_v46 = vadd.f32 %v4739_v30, %v1143_v0  ;;  %v1195_v13 = vmax.f32 %v1141_v60, 0.0 }
 0x37f   :  { %v1198_v6 = vmax.f32 %v1152_v36, 0.0 }
 0x380   :  { %v1196_v9 = vmax.f32 %v1144_v46, 0.0 }
 0x381   :  { %v1216_v11 = vpack.c.bf16 %v1198_v6, %v1197_v8  ;;  %v5084_v6 = vld [vmem:[#allocation41_spill] sm:$0xff] }
 0x382   :  { %v1215_v32 = vpack.c.bf16 %v1196_v9, %v1195_v13  ;;  %v3604_v51 = vpop.f32.mrb[44].mxu1  ;;  %v5085_v9 = vld [vmem:[#allocation38_spill] sm:$0xff] }
 0x383   :  { %v1165_v55 = vadd.f32 %v3604_v51, %v4739_v30  ;;  %v1156_v42 = vpop.f32.mrb[45].mxu1  ;;  %v5087_v51 = vld [vmem:[#allocation39_spill] sm:$0xff] }
 0x384   :  { %v1157_v15 = vadd.f32 %v4739_v30, %v1156_v42  ;;  %v3605_v18 = vpop.f32.mrb[46].mxu1  ;;  %3646 = vmatprep.mubr.bf16.mxu0 %v1215_v32 }
 0x385   :  { %v1168_v20 = vadd.f32 %v3605_v18, %v4739_v30  ;;  %v1159_v17 = vpop.f32.mrb[47].mxu1  ;;  %3647 = vmatmul.mubr.bf16.gmra.mrb[56].mxu0 %v1216_v11  ;;  %v1201_v31 = vmax.f32 %v1165_v55, 0.0  ;;  %v5088_v18 = vld [vmem:[#allocation23_spill] sm:$0xff] }
 0x386   :  { %v1160_v19 = vadd.f32 %v4739_v30, %v1159_v17  ;;  %v1199_v56 = vmax.f32 %v1157_v15, 0.0 }
 0x387   :  { %v1202_v4 = vmax.f32 %v1168_v20, 0.0  ;;  %v5089_v20 = vld [vmem:[#allocation22_spill] sm:$0xff] }
 0x388   :  { %v1200_v16 = vmax.f32 %v1160_v19, 0.0  ;;  %v5090_v17 = vpack.c.bf16 %v5088_v18, %v5089_v20  ;;  %v5091_v19 = vld [vmem:[#allocation21_spill] sm:$0xff] }
 0x389   :  { %v1218_v47 = vpack.c.bf16 %v1202_v4, %v1201_v31  ;;  %v5092_v31 = vld [vmem:[#allocation20_spill] sm:$0xff] }
 0x38a   :  { %v1217_v21 = vpack.c.bf16 %v1200_v16, %v1199_v56  ;;  %v3672_v44 = vpop.f32.mrb[48].mxu1  ;;  %v5093_v4 = vpack.c.bf16 %v5091_v19, %v5092_v31  ;;  %v5094_v56 = vld [vmem:[#allocation27_spill] sm:$0xff]  ;;  %v5095_v16 = vld [vmem:[#allocation26_spill] sm:$0xff] }
 0x38b   :  { %v1543_v48 = vpop.f32.mrb[49].mxu1  ;;  %v1608_v59 = vadd.f32 %v3672_v44, %v4431_v1  ;;  %v5098_v44 = vld [vmem:[#allocation24_spill] sm:$0xff] }
 0x38c   :  { %3650 = vmatprep.mubr.bf16.mxu0 %v1217_v21  ;;  %v3673_v40 = vpop.f32.mrb[50].mxu1  ;;  %v1606_v38 = vadd.f32 %v1543_v48, %v4417_v58  ;;  %v5097_v21 = vld [vmem:[#allocation25_spill] sm:$0xff] }
 0x38d   :  { %v1609_v12 = vadd.f32 %v3673_v40, %v4423_v61  ;;  %3651 = vmatmul.mubr.bf16.gmra.mrb[60].mxu0 %v1218_v47  ;;  %v1546_v35 = vpop.f32.mrb[51].mxu1  ;;  %v5096_v47 = vpack.c.bf16 %v5094_v56, %v5095_v16  ;;  %v5099_v48 = vpack.c.bf16 %v5097_v21, %v5098_v44  ;;  %v5100_v40 = vld [vmem:[#allocation33_spill] sm:$0xff] }
 0x38e   :  { %v1607_v30 = vadd.f32 %v1546_v35, %v4425_v62  ;;  %v5103_v35 = vld [vmem:[#allocation30_spill] sm:$0xff] }
 0x38f   :  { %v1623_v50 = vpack.c.bf16 %v1609_v12, %v1608_v59  ;;  %v5101_v59 = vld [vmem:[#allocation31_spill] sm:$0xff] }
 0x390   :  { %v1622_v34 = vpack.c.bf16 %v1607_v30, %v1606_v38  ;;  %v5102_v12 = vpack.c.bf16 %v5100_v40, %v5101_v59  ;;  %v5104_v38 = vld [vmem:[#allocation28_spill] sm:$0xff] }
 0x391   :  { %v5105_v30 = vpack.c.bf16 %v5103_v35, %v5104_v38 }
 0x392   :  { %v3676_v43 = vpop.f32.mrb[52].mxu1  ;;  %3702 = vmatprep.mubr.bf16.mxu0 %v1622_v34  ;;  %v5107_v34 = vld [vmem:[#allocation37_spill] sm:$0xff] }
 0x393   :  { %v1559_v5 = vpop.f32.mrb[53].mxu1  ;;  %v1612_v28 = vadd.f32 %v3676_v43, %v4459_v29  ;;  %v5082_v29 = vld [vmem:[#allocation29_spill] sm:$0xff] }
 0x394   :  { %v3677_v33 = vpop.f32.mrb[54].mxu1  ;;  %v1610_v61 = vadd.f32 %v1559_v5, %v4445_v22  ;;  %v5109_v5 = vld [vmem:[#allocation36_spill] sm:$0xff] }
 0x395   :  { %v1613_v41 = vadd.f32 %v3677_v33, %v4451_v25  ;;  %v1562_v14 = vpop.f32.mrb[55].mxu1  ;;  %3703 = vmatmul.mubr.bf16.vlgmr.msra.gmra.mrb[64].mxu0 %v1623_v50  ;;  %v5106_v50 = vld [vmem:[#allocation40_spill] sm:$0xff]  ;;  %v5110_v33 = vld [vmem:[#allocation34_spill] sm:$0xff] }
 0x396   :  { %v1611_v1 = vadd.f32 %v1562_v14, %v4453_v26  ;;  %v5108_v43 = vpack.c.bf16 %v5106_v50, %v5107_v34  ;;  %v4027_v14 = vld [vmem:[#allocation13 + $0x148] sm:$0xff]  }
 0x397   :  { %v1625_v10 = vpack.c.bf16 %v1613_v41, %v1612_v28  ;;  %v5111_v28 = vpack.c.bf16 %v5109_v5, %v5110_v33  ;;  %v4026_v41 = vld [vmem:[#allocation13 + $0x140] sm:$0xff]  }
 0x398   :  { %v1624_v58 = vpack.c.bf16 %v1611_v1, %v1610_v61  ;;  %3734 = vmatprep.subr.bf16.mxu1 %v4026_v41  ;;  %v4028_v61 = vld [vmem:[#allocation13 + $0x150] sm:$0xff]   ;;  %v4029_v1 = vld [vmem:[#allocation13 + $0x158] sm:$0xff]  }
 0x399   :  { %3735 = vmatpush3.bf16.msra.mxu1 %v4026_v41 }
 0x39a   :  { %v3680_v24 = vpop.f32.mrb[56].mxu1  ;;  %3706 = vmatprep.mubr.bf16.mxu0 %v1624_v58  ;;  %3736 = vmatprep.subr.bf16.mxu1 %v4027_v14  ;;  %v4031_v58 = vld [vmem:[#allocation13 + $0x168] sm:$0xff]  }
 0x39b   :  { %v1575_v62 = vpop.f32.mrb[57].mxu1  ;;  %v1616_v49 = vadd.f32 %v3680_v24, %v4487_v3  ;;  %v5086_v3 = vld [vmem:[#allocation35_spill] sm:$0xff]  ;;  %v4032_v24 = vld [vmem:[#allocation13 + $0x170] sm:$0xff]  }
 0x39c   :  { %v3681_v37 = vpop.f32.mrb[58].mxu1  ;;  %v1614_v25 = vadd.f32 %v1575_v62, %v5082_v29  ;;  %v3155_v62 = vld [vmem:[%s5028_s7 + $0x3] ss:$0 sm:$0xff] }
 0x39d   :  { %v1617_v57 = vadd.f32 %v3681_v37, %v4479_v54  ;;  %v1578_v60 = vpop.f32.mrb[59].mxu1  ;;  %3707 = vmatmul.mubr.bf16.gmra.mrb[68].mxu0 %v1625_v10  ;;  %3737 = vmatpush3.bf16.msra.mxu1 %v4027_v14  ;;  %v4030_v10 = vld [vmem:[#allocation13 + $0x160] sm:$0xff]  }
 0x39e   :  { %v1615_v36 = vadd.f32 %v1578_v60, %v5083_v23  ;;  %3738 = vmatprep.subr.bf16.mxu1 %v4028_v61 }
 0x39f   :  { %v1627_v0 = vpack.c.bf16 %v1617_v57, %v1616_v49 }
 0x3a0   :  { %v1626_v22 = vpack.c.bf16 %v1615_v36, %v1614_v25  ;;  %v4817_v36 = vld [vmem:[#allocation13 + $0x200] sm:$0xff]  }
 0x3a1   :  { %3739 = vmatpush3.bf16.msra.mxu1 %v4028_v61 }
 0x3a2   :  { %v3684_v46 = vpop.f32.mrb[60].mxu1  ;;  %3710 = vmatprep.mubr.bf16.mxu0 %v1626_v22  ;;  %3740 = vmatprep.subr.bf16.mxu1 %v4029_v1 }
 0x3a3   :  { %v1591_v26 = vpop.f32.mrb[61].mxu1  ;;  %v1620_v13 = vadd.f32 %v3684_v46, %v5084_v6 }
 0x3a4   :  { %v3685_v8 = vpop.f32.mrb[62].mxu1  ;;  %v1618_v54 = vadd.f32 %v1591_v26, %v5086_v3 }
 0x3a5   :  { %v1621_v11 = vadd.f32 %v3685_v8, %v5085_v9  ;;  %v1594_v32 = vpop.f32.mrb[63].mxu1  ;;  %3711 = vmatmul.mubr.bf16.gmra.mrb[72].mxu0 %v1627_v0  ;;  %3741 = vmatpush3.bf16.msra.mxu1 %v4029_v1 }
 0x3a6   :  { %v1619_v55 = vadd.f32 %v1594_v32, %v5087_v51  ;;  %3742 = vmatprep.subr.bf16.mxu1 %v4030_v10 }
 0x3a7   :  { %v1629_v42 = vpack.c.bf16 %v1621_v11, %v1620_v13 }
 0x3a8   :  { %v1628_v15 = vpack.c.bf16 %v1619_v55, %v1618_v54 }
 0x3a9   :  { %3743 = vmatpush3.bf16.msra.mxu1 %v4030_v10 }
 0x3aa   :  { %3714 = vmatprep.mubr.bf16.mxu0 %v1628_v15  ;;  %3744 = vmatprep.subr.bf16.mxu1 %v4031_v58 }
 0x3ad   :  { %3715 = vmatmul.mubr.bf16.gmra.mrb[76].mxu0 %v1629_v42  ;;  %3745 = vmatpush3.bf16.msra.mxu1 %v4031_v58 }
 0x3ae   :  { %3718 = vmatprep.mubr.bf16.mxu0 %v5090_v17  ;;  %3746 = vmatprep.subr.bf16.mxu1 %v4032_v24 }
 0x3b1   :  { %3747 = vmatpush3.bf16.msra.mxu1 %v4032_v24 }
 0x3b5   :  { %3719 = vmatmul.mubr.bf16.gmra.mrb[80].mxu0 %v5093_v4 }
 0x3b6   :  { %3722 = vmatprep.mubr.bf16.mxu0 %v5096_v47 }
 0x3bd   :  { %3723 = vmatmul.mubr.bf16.gmra.mrb[84].mxu0 %v5099_v48 }
 0x3be   :  { %3726 = vmatprep.mubr.bf16.mxu0 %v5102_v12 }
 0x3c5   :  { %3727 = vmatmul.mubr.bf16.gmra.mrb[88].mxu0 %v5105_v30 }
 0x3c6   :  { %3730 = vmatprep.mubr.bf16.mxu0 %v5108_v43 }
 0x3cd   :  { %3731 = vmatmul.mubr.bf16.gmra.mrb[92].mxu0 %v5111_v28 }
 0x3ce   :  { %3798 = vmatprep.mubr.bf16.mxu0 %v4709_v45  ;;  %v4033_v45 = vld [vmem:[#allocation13 + $0x178] sm:$0xff]  }
 0x3cf   :  { %3748 = vmatprep.subr.bf16.mxu1 %v4033_v45 }
 0x3d0   :  { %3749 = vmatpush3.bf16.msra.mxu1 %v4033_v45 }
 0x3d1   :  { %3814 = vmatprep.subr.bf16.mxu1 %v4817_v36 }
 0x428   :  { %v3624_v37 = vpop.f32.mrb[32].mxu0 }
 0x429   :  { %v1335_v49 = vadd.f32 %v3624_v37, %v3155_v62  ;;  %v1326_v57 = vpop.f32.mrb[33].mxu0 }
 0x42a   :  { %v1327_v60 = vadd.f32 %v3155_v62, %v1326_v57  ;;  %v3625_v29 = vpop.f32.mrb[34].mxu0 }
 0x42b   :  { %v1338_v25 = vadd.f32 %v3625_v29, %v3155_v62  ;;  %v1329_v23 = vpop.f32.mrb[35].mxu0  ;;  %v1439_v22 = vmax.f32 %v1335_v49, 0.0 }
 0x42c   :  { %v1330_v0 = vadd.f32 %v3155_v62, %v1329_v23  ;;  %v1437_v26 = vmax.f32 %v1327_v60, 0.0 }
 0x42d   :  { %v1440_v46 = vmax.f32 %v1338_v25, 0.0 }
 0x42e   :  { %v1438_v8 = vmax.f32 %v1330_v0, 0.0 }
 0x42f   :  { %v2187_v6 = vpack.c.bf16 %v1440_v46, %v1439_v22 }
 0x430   :  { %v2186_v13 = vpack.c.bf16 %v1438_v8, %v1437_v26  ;;  %v3628_v9 = vpop.f32.mrb[36].mxu0 }
 0x431   :  { %v1351_v11 = vadd.f32 %v3628_v9, %v3155_v62  ;;  %v1342_v32 = vpop.f32.mrb[37].mxu0 }
 0x432   :  { %v1343_v3 = vadd.f32 %v3155_v62, %v1342_v32  ;;  %v3629_v54 = vpop.f32.mrb[38].mxu0  ;;  %3782 = vmatprep.subr.bf16.mxu0 %v2186_v13 }
 0x433   :  { %v1354_v51 = vadd.f32 %v3629_v54, %v3155_v62  ;;  %v1345_v55 = vpop.f32.mrb[39].mxu0  ;;  %3783 = vmatpush3.bf16.msra.mxu0 %v2186_v13  ;;  %v1443_v15 = vmax.f32 %v1351_v11, 0.0 }
 0x434   :  { %v1346_v42 = vadd.f32 %v3155_v62, %v1345_v55  ;;  %3784 = vmatprep.subr.bf16.mxu0 %v2187_v6  ;;  %v1441_v20 = vmax.f32 %v1343_v3, 0.0 }
 0x435   :  { %v1444_v18 = vmax.f32 %v1354_v51, 0.0 }
 0x436   :  { %v1442_v17 = vmax.f32 %v1346_v42, 0.0 }
 0x437   :  { %v2189_v19 = vpack.c.bf16 %v1444_v18, %v1443_v15  ;;  %3785 = vmatpush3.bf16.msra.mxu0 %v2187_v6 }
 0x438   :  { %v2188_v31 = vpack.c.bf16 %v1442_v17, %v1441_v20  ;;  %v3632_v4 = vpop.f32.mrb[40].mxu0 }
 0x439   :  { %v1367_v56 = vadd.f32 %v3632_v4, %v3155_v62  ;;  %v1358_v16 = vpop.f32.mrb[41].mxu0  ;;  %v4035_v4 = vld [vmem:[#allocation13 + $0x208] sm:$0xff]  }
 0x43a   :  { %v1359_v47 = vadd.f32 %v3155_v62, %v1358_v16  ;;  %v3633_v21 = vpop.f32.mrb[42].mxu0  ;;  %3786 = vmatprep.subr.bf16.mxu0 %v2188_v31 }
 0x43b   :  { %v1370_v44 = vadd.f32 %v3633_v21, %v3155_v62  ;;  %v1361_v48 = vpop.f32.mrb[43].mxu0  ;;  %3787 = vmatpush3.bf16.msra.mxu0 %v2188_v31  ;;  %v1447_v59 = vmax.f32 %v1367_v56, 0.0 }
 0x43c   :  { %v1362_v40 = vadd.f32 %v3155_v62, %v1361_v48  ;;  %3788 = vmatprep.subr.bf16.mxu0 %v2189_v19  ;;  %v1445_v35 = vmax.f32 %v1359_v47, 0.0 }
 0x43d   :  { %v1448_v12 = vmax.f32 %v1370_v44, 0.0 }
 0x43e   :  { %v1446_v38 = vmax.f32 %v1362_v40, 0.0  ;;  %v4036_v40 = vld [vmem:[#allocation13 + $0x210] sm:$0xff]  }
 0x43f   :  { %v2191_v30 = vpack.c.bf16 %v1448_v12, %v1447_v59  ;;  %3789 = vmatpush3.bf16.msra.mxu0 %v2189_v19 }
 0x440   :  { %v2190_v50 = vpack.c.bf16 %v1446_v38, %v1445_v35  ;;  %v3636_v34 = vpop.f32.mrb[44].mxu0 }
 0x441   :  { %v1383_v43 = vadd.f32 %v3636_v34, %v3155_v62  ;;  %v1374_v5 = vpop.f32.mrb[45].mxu0 }
 0x442   :  { %v1375_v33 = vadd.f32 %v3155_v62, %v1374_v5  ;;  %v3637_v28 = vpop.f32.mrb[46].mxu0  ;;  %3790 = vmatprep.subr.bf16.mxu0 %v2190_v50 }
 0x443   :  { %v1386_v41 = vadd.f32 %v3637_v28, %v3155_v62  ;;  %v1377_v14 = vpop.f32.mrb[47].mxu0  ;;  %3791 = vmatpush3.bf16.msra.mxu0 %v2190_v50  ;;  %v1451_v1 = vmax.f32 %v1383_v43, 0.0  ;;  %v4037_v43 = vld [vmem:[#allocation13 + $0x218] sm:$0xff]  }
 0x444   :  { %v1378_v61 = vadd.f32 %v3155_v62, %v1377_v14  ;;  %3792 = vmatprep.subr.bf16.mxu0 %v2191_v30  ;;  %v1449_v58 = vmax.f32 %v1375_v33, 0.0 }
 0x445   :  { %v1452_v10 = vmax.f32 %v1386_v41, 0.0 }
 0x446   :  { %v1450_v24 = vmax.f32 %v1378_v61, 0.0 }
 0x447   :  { %v2193_v45 = vpack.c.bf16 %v1452_v10, %v1451_v1  ;;  %3793 = vmatpush3.bf16.msra.mxu0 %v2191_v30  ;;  %v4038_v1 = vld [vmem:[#allocation13 + $0x220] sm:$0xff]  }
 0x448   :  { %v2192_v37 = vpack.c.bf16 %v1450_v24, %v1449_v58  ;;  %v3640_v49 = vpop.f32.mrb[48].mxu0 }
 0x449   :  { %v1390_v57 = vpop.f32.mrb[49].mxu0 }
 0x44a   :  { %v3641_v60 = vpop.f32.mrb[50].mxu0  ;;  %3794 = vmatprep.subr.bf16.mxu0 %v2192_v37 }
 0x44b   :  { %v1392_v29 = vpop.f32.mrb[51].mxu0  ;;  %3795 = vmatpush3.bf16.msra.mxu0 %v2192_v37  ;;  %v4039_v60 = vld [vmem:[#allocation13 + $0x228] sm:$0xff]  }
 0x44c   :  { %3796 = vmatprep.subr.bf16.mxu0 %v2193_v45 }
 0x44f   :  { %3797 = vmatpush3.bf16.msra.mxu0 %v2193_v45 }
 0x450   :  { %v3644_v25 = vpop.f32.mrb[52].mxu0 }
 0x451   :  { %v1402_v23 = vpop.f32.mrb[53].mxu0 }
 0x452   :  { %v3645_v0 = vpop.f32.mrb[54].mxu0  ;;  %3799 = vmatmul.mubr.bf16.vlgmr.msra.gmra.mrb[96].mxu0 %v4715_v2  ;;  %v4829_v2 = vld [vmem:[%s5028_s7 + $0x4] ss:$0 sm:$0xff] }
 0x453   :  { %v1404_v62 = vpop.f32.mrb[55].mxu0  ;;  %3802 = vmatprep.mubr.bf16.mxu0 %v4717_v53 }
 0x458   :  { %v3648_v22 = vpop.f32.mrb[56].mxu0 }
 0x459   :  { %v1414_v46 = vpop.f32.mrb[57].mxu0 }
 0x45a   :  { %v3649_v26 = vpop.f32.mrb[58].mxu0  ;;  %3803 = vmatmul.mubr.bf16.gmra.mrb[100].mxu0 %v4721_v52 }
 0x45b   :  { %v1416_v8 = vpop.f32.mrb[59].mxu0  ;;  %3806 = vmatprep.mubr.bf16.mxu0 %v4723_v27  ;;  %v4040_v26 = vld [vmem:[#allocation13 + $0x230] sm:$0xff]  }
 0x460   :  { %v3652_v6 = vpop.f32.mrb[60].mxu0 }
 0x461   :  { %v1426_v13 = vpop.f32.mrb[61].mxu0 }
 0x462   :  { %v3653_v9 = vpop.f32.mrb[62].mxu0  ;;  %3807 = vmatmul.mubr.bf16.gmra.mrb[104].mxu0 %v4727_v63 }
 0x463   :  { %v1428_v11 = vpop.f32.mrb[63].mxu0  ;;  %3810 = vmatprep.mubr.bf16.mxu0 %v4729_v7 }
 0x468   :  { %v3704_v53 = vpop.f32.mrb[64].mxu0 }
 0x469   :  { %v1754_v32 = vadd.f32 %v3704_v53, %v4829_v2  ;;  %v1745_v52 = vpop.f32.mrb[65].mxu0 }
 0x46a   :  { %v1746_v3 = vadd.f32 %v4829_v2, %v1745_v52  ;;  %v3705_v27 = vpop.f32.mrb[66].mxu0  ;;  %3811 = vmatmul.mubr.bf16.gmra.mrb[108].mxu0 %v4733_v39 }
 0x46b   :  { %v1757_v54 = vadd.f32 %v3705_v27, %v4829_v2  ;;  %v1748_v63 = vpop.f32.mrb[67].mxu0  ;;  %v1874_v7 = vmax.f32 %v1754_v32, 0.0 }
 0x46c   :  { %v1749_v51 = vadd.f32 %v4829_v2, %v1748_v63  ;;  %v1872_v42 = vmax.f32 %v1746_v3, 0.0 }
 0x46d   :  { %v1875_v55 = vmax.f32 %v1757_v54, 0.0 }
 0x46e   :  { %v1873_v15 = vmax.f32 %v1749_v51, 0.0 }
 0x46f   :  { %v1905_v18 = vpack.c.bf16 %v1875_v55, %v1874_v7 }
 0x470   :  { %v1904_v20 = vpack.c.bf16 %v1873_v15, %v1872_v42  ;;  %v3708_v17 = vpop.f32.mrb[68].mxu0 }
 0x471   :  { %v1770_v19 = vadd.f32 %v3708_v17, %v4829_v2  ;;  %v1761_v31 = vpop.f32.mrb[69].mxu0 }
 0x472   :  { %v1762_v56 = vadd.f32 %v4829_v2, %v1761_v31  ;;  %v3709_v16 = vpop.f32.mrb[70].mxu0  ;;  %3750 = vmatprep.mubr.bf16.mxu1 %v1904_v20 }
 0x473   :  { %v1773_v39 = vadd.f32 %v3709_v16, %v4829_v2  ;;  %v1764_v47 = vpop.f32.mrb[71].mxu0  ;;  %3751 = vmatmul.mubr.bf16.vlgmr.msra.gmra.mrb[64].mxu1 %v1905_v18  ;;  %v1878_v44 = vmax.f32 %v1770_v19, 0.0 }
 0x474   :  { %v1765_v21 = vadd.f32 %v4829_v2, %v1764_v47  ;;  %3815 = vmatpush3.bf16.msra.mxu1 %v4817_v36  ;;  %v1876_v59 = vmax.f32 %v1762_v56, 0.0 }
 0x475   :  { %v1879_v48 = vmax.f32 %v1773_v39, 0.0  ;;  %3816 = vmatprep.subr.bf16.mxu1 %v4035_v4 }
 0x476   :  { %v1877_v12 = vmax.f32 %v1765_v21, 0.0 }
 0x477   :  { %v1907_v35 = vpack.c.bf16 %v1879_v48, %v1878_v44 }
 0x478   :  { %v1906_v38 = vpack.c.bf16 %v1877_v12, %v1876_v59  ;;  %v3712_v30 = vpop.f32.mrb[72].mxu0  ;;  %3817 = vmatpush3.bf16.msra.mxu1 %v4035_v4 }
 0x479   :  { %v1786_v50 = vadd.f32 %v3712_v30, %v4829_v2  ;;  %v1777_v34 = vpop.f32.mrb[73].mxu0  ;;  %3818 = vmatprep.subr.bf16.mxu1 %v4036_v40 }
 0x47a   :  { %v1778_v5 = vadd.f32 %v4829_v2, %v1777_v34  ;;  %v3713_v33 = vpop.f32.mrb[74].mxu0  ;;  %3754 = vmatprep.mubr.bf16.mxu1 %v1906_v38 }
 0x47b   :  { %v1789_v36 = vadd.f32 %v3713_v33, %v4829_v2  ;;  %v1780_v28 = vpop.f32.mrb[75].mxu0  ;;  %3755 = vmatmul.mubr.bf16.gmra.mrb[68].mxu1 %v1907_v35  ;;  %v1882_v14 = vmax.f32 %v1786_v50, 0.0 }
 0x47c   :  { %v1781_v41 = vadd.f32 %v4829_v2, %v1780_v28  ;;  %3819 = vmatpush3.bf16.msra.mxu1 %v4036_v40  ;;  %v1880_v10 = vmax.f32 %v1778_v5, 0.0 }
 0x47d   :  { %v1883_v61 = vmax.f32 %v1789_v36, 0.0  ;;  %3820 = vmatprep.subr.bf16.mxu1 %v4037_v43 }
 0x47e   :  { %v1881_v58 = vmax.f32 %v1781_v41, 0.0 }
 0x47f   :  { %v1909_v24 = vpack.c.bf16 %v1883_v61, %v1882_v14 }
 0x480   :  { %v1908_v45 = vpack.c.bf16 %v1881_v58, %v1880_v10  ;;  %v3716_v37 = vpop.f32.mrb[76].mxu0  ;;  %3821 = vmatpush3.bf16.msra.mxu1 %v4037_v43 }
 0x481   :  { %v1802_v49 = vadd.f32 %v3716_v37, %v4829_v2  ;;  %v1793_v57 = vpop.f32.mrb[77].mxu0  ;;  %3822 = vmatprep.subr.bf16.mxu1 %v4038_v1 }
 0x482   :  { %v1794_v29 = vadd.f32 %v4829_v2, %v1793_v57  ;;  %v3717_v25 = vpop.f32.mrb[78].mxu0  ;;  %3758 = vmatprep.mubr.bf16.mxu1 %v1908_v45 }
 0x483   :  { %v1805_v23 = vadd.f32 %v3717_v25, %v4829_v2  ;;  %v1796_v0 = vpop.f32.mrb[79].mxu0  ;;  %3759 = vmatmul.mubr.bf16.gmra.mrb[72].mxu1 %v1909_v24  ;;  %v1886_v22 = vmax.f32 %v1802_v49, 0.0 }
 0x484   :  { %v1797_v62 = vadd.f32 %v4829_v2, %v1796_v0  ;;  %3823 = vmatpush3.bf16.msra.mxu1 %v4038_v1  ;;  %v1884_v8 = vmax.f32 %v1794_v29, 0.0 }
 0x485   :  { %v1887_v46 = vmax.f32 %v1805_v23, 0.0  ;;  %3824 = vmatprep.subr.bf16.mxu1 %v4039_v60 }
 0x486   :  { %v1885_v6 = vmax.f32 %v1797_v62, 0.0 }
 0x487   :  { %v1911_v13 = vpack.c.bf16 %v1887_v46, %v1886_v22  ;;  %v4041_v22 = vld [vmem:[#allocation13 + $0x238] sm:$0xff]   ;;  %v4042_v46 = vld [vmem:[#allocation13 + $0x240] sm:$0xff]  }
 0x488   :  { %v1910_v9 = vpack.c.bf16 %v1885_v6, %v1884_v8  ;;  %v3720_v11 = vpop.f32.mrb[80].mxu0  ;;  %3825 = vmatpush3.bf16.msra.mxu1 %v4039_v60  ;;  %3862 = vmatprep.subr.bf16.mxu0 %v4042_v46  ;;  %v4044_v8 = vld [vmem:[#allocation13 + $0x250] sm:$0xff]   ;;  %v4046_v6 = vld [vmem:[#allocation13 + $0x260] sm:$0xff]  }
 0x489   :  { %v1818_v53 = vadd.f32 %v3720_v11, %v4829_v2  ;;  %v1809_v32 = vpop.f32.mrb[81].mxu0  ;;  %3826 = vmatprep.subr.bf16.mxu1 %v4040_v26  ;;  %3863 = vmatpush3.bf16.msra.mxu0 %v4042_v46 }
 0x48a   :  { %v1810_v52 = vadd.f32 %v4829_v2, %v1809_v32  ;;  %v3721_v3 = vpop.f32.mrb[82].mxu0  ;;  %3762 = vmatprep.mubr.bf16.mxu1 %v1910_v9 }
 0x48b   :  { %v1821_v27 = vadd.f32 %v3721_v3, %v4829_v2  ;;  %v1812_v54 = vpop.f32.mrb[83].mxu0  ;;  %3763 = vmatmul.mubr.bf16.gmra.mrb[76].mxu1 %v1911_v13  ;;  %v1890_v51 = vmax.f32 %v1818_v53, 0.0  ;;  %v4047_v13 = vld [vmem:[#allocation13 + $0x268] sm:$0xff]  }
 0x48c   :  { %v1813_v63 = vadd.f32 %v4829_v2, %v1812_v54  ;;  %3827 = vmatpush3.bf16.msra.mxu1 %v4040_v26  ;;  %v1888_v55 = vmax.f32 %v1810_v52, 0.0  ;;  %v4043_v26 = vld [vmem:[#allocation13 + $0x248] sm:$0xff]  }
 0x48d   :  { %v1891_v7 = vmax.f32 %v1821_v27, 0.0  ;;  %3828 = vmatprep.subr.bf16.mxu1 %v4041_v22  ;;  %3864 = vmatprep.subr.bf16.mxu0 %v4043_v26 }
 0x48e   :  { %v1889_v42 = vmax.f32 %v1813_v63, 0.0  ;;  %3865 = vmatpush3.bf16.msra.mxu0 %v4043_v26 }
 0x48f   :  { %v1913_v15 = vpack.c.bf16 %v1891_v7, %v1890_v51  ;;  %3866 = vmatprep.subr.bf16.mxu0 %v4044_v8 }
 0x490   :  { %v1912_v18 = vpack.c.bf16 %v1889_v42, %v1888_v55  ;;  %v3724_v20 = vpop.f32.mrb[84].mxu0  ;;  %3829 = vmatpush3.bf16.msra.mxu1 %v4041_v22 }
 0x491   :  { %v1834_v17 = vadd.f32 %v3724_v20, %v4829_v2  ;;  %v1825_v19 = vpop.f32.mrb[85].mxu0 }
 0x492   :  { %v1826_v31 = vadd.f32 %v4829_v2, %v1825_v19  ;;  %v3725_v4 = vpop.f32.mrb[86].mxu0  ;;  %3766 = vmatprep.mubr.bf16.mxu1 %v1912_v18  ;;  %3867 = vmatpush3.bf16.msra.mxu0 %v4044_v8 }
 0x493   :  { %v1837_v56 = vadd.f32 %v3725_v4, %v4829_v2  ;;  %v1828_v16 = vpop.f32.mrb[87].mxu0  ;;  %3767 = vmatmul.mubr.bf16.gmra.mrb[80].mxu1 %v1913_v15  ;;  %v1894_v47 = vmax.f32 %v1834_v17, 0.0  ;;  %v4876_v17 = vld [vmem:[%s5028_s7 + $0x5] ss:$0 sm:$0xff] }
 0x494   :  { %v1829_v39 = vadd.f32 %v4829_v2, %v1828_v16  ;;  %v1892_v44 = vmax.f32 %v1826_v31, 0.0 }
 0x495   :  { %v1895_v21 = vmax.f32 %v1837_v56, 0.0 }
 0x496   :  { %v1893_v48 = vmax.f32 %v1829_v39, 0.0 }
 0x497   :  { %v1915_v40 = vpack.c.bf16 %v1895_v21, %v1894_v47 }
 0x498   :  { %v1914_v59 = vpack.c.bf16 %v1893_v48, %v1892_v44  ;;  %v3728_v12 = vpop.f32.mrb[88].mxu0 }
 0x499   :  { %v1850_v35 = vadd.f32 %v3728_v12, %v4829_v2  ;;  %v1841_v38 = vpop.f32.mrb[89].mxu0 }
 0x49a   :  { %v1842_v30 = vadd.f32 %v4829_v2, %v1841_v38  ;;  %v3729_v50 = vpop.f32.mrb[90].mxu0  ;;  %3770 = vmatprep.mubr.bf16.mxu1 %v1914_v59 }
 0x49b   :  { %v1853_v34 = vadd.f32 %v3729_v50, %v4829_v2  ;;  %v1844_v43 = vpop.f32.mrb[91].mxu0  ;;  %3771 = vmatmul.mubr.bf16.gmra.mrb[84].mxu1 %v1915_v40  ;;  %v1898_v33 = vmax.f32 %v1850_v35, 0.0 }
 0x49c   :  { %v1845_v5 = vadd.f32 %v4829_v2, %v1844_v43  ;;  %v1896_v28 = vmax.f32 %v1842_v30, 0.0 }
 0x49d   :  { %v1899_v36 = vmax.f32 %v1853_v34, 0.0 }
 0x49e   :  { %v1897_v41 = vmax.f32 %v1845_v5, 0.0 }
 0x49f   :  { %v1917_v14 = vpack.c.bf16 %v1899_v36, %v1898_v33 }
 0x4a0   :  { %v1916_v61 = vpack.c.bf16 %v1897_v41, %v1896_v28  ;;  %v3732_v1 = vpop.f32.mrb[92].mxu0 }
 0x4a1   :  { %v1866_v10 = vadd.f32 %v3732_v1, %v4829_v2  ;;  %v1857_v58 = vpop.f32.mrb[93].mxu0 }
 0x4a2   :  { %v1858_v24 = vadd.f32 %v4829_v2, %v1857_v58  ;;  %v3733_v45 = vpop.f32.mrb[94].mxu0  ;;  %3774 = vmatprep.mubr.bf16.mxu1 %v1916_v61 }
 0x4a3   :  { %v1869_v37 = vadd.f32 %v3733_v45, %v4829_v2  ;;  %v1860_v49 = vpop.f32.mrb[95].mxu0  ;;  %3775 = vmatmul.mubr.bf16.gmra.mrb[88].mxu1 %v1917_v14  ;;  %v1902_v60 = vmax.f32 %v1866_v10, 0.0 }
 0x4a4   :  { %v1861_v57 = vadd.f32 %v4829_v2, %v1860_v49  ;;  %v1900_v25 = vmax.f32 %v1858_v24, 0.0  ;;  %v4045_v2 = vld [vmem:[#allocation13 + $0x258] sm:$0xff]  }
 0x4a5   :  { %v1903_v29 = vmax.f32 %v1869_v37, 0.0  ;;  %3868 = vmatprep.subr.bf16.mxu0 %v4045_v2 }
 0x4a6   :  { %v1901_v23 = vmax.f32 %v1861_v57, 0.0  ;;  %3869 = vmatpush3.bf16.msra.mxu0 %v4045_v2 }
 0x4a7   :  { %v1919_v0 = vpack.c.bf16 %v1903_v29, %v1902_v60  ;;  %3870 = vmatprep.subr.bf16.mxu0 %v4046_v6 }
 0x4a8   :  { %v1918_v62 = vpack.c.bf16 %v1901_v23, %v1900_v25 }
 0x4aa   :  { %3778 = vmatprep.mubr.bf16.mxu1 %v1918_v62  ;;  %3871 = vmatpush3.bf16.msra.mxu0 %v4046_v6 }
 0x4ab   :  { %3779 = vmatmul.mubr.bf16.gmra.mrb[92].mxu1 %v1919_v0  ;;  %3872 = vmatprep.subr.bf16.mxu0 %v4047_v13 }
 0x4ae   :  { %3873 = vmatpush3.bf16.msra.mxu0 %v4047_v13 }
 0x525   :  { %v3800_v9 = vpop.f32.mrb[96].mxu0 }
 0x526   :  { %v2228_v11 = vpop.f32.mrb[97].mxu0 }
 0x527   :  { %v3801_v53 = vpop.f32.mrb[98].mxu0 }
 0x528   :  { %v2231_v32 = vpop.f32.mrb[99].mxu0 }
 0x52d   :  { %v3804_v52 = vpop.f32.mrb[100].mxu0 }
 0x52e   :  { %v2244_v3 = vpop.f32.mrb[101].mxu0 }
 0x52f   :  { %v3805_v27 = vpop.f32.mrb[102].mxu0 }
 0x530   :  { %v2247_v54 = vpop.f32.mrb[103].mxu0 }
 0x535   :  { %v3808_v63 = vpop.f32.mrb[104].mxu0 }
 0x536   :  { %v2260_v51 = vpop.f32.mrb[105].mxu0 }
 0x537   :  { %v3809_v7 = vpop.f32.mrb[106].mxu0 }
 0x538   :  { %v2263_v55 = vpop.f32.mrb[107].mxu0 }
 0x53d   :  { %v4865_v42 = vpop.f32.mrb[108].mxu0 }
 0x53e   :  { %v4867_v15 = vpop.f32.mrb[109].mxu0 }
 0x53f   :  { %v4869_v18 = vpop.f32.mrb[110].mxu0 }
 0x540   :  { %v4871_v20 = vpop.f32.mrb[111].mxu0 }
 0x546   :  { %v3752_v19 = vpop.f32.mrb[64].mxu1 }
 0x547   :  { %v2036_v31 = vadd.f32 %v3752_v19, %v4876_v17  ;;  %v2027_v4 = vpop.f32.mrb[65].mxu1 }
 0x548   :  { %v2028_v56 = vadd.f32 %v4876_v17, %v2027_v4  ;;  %v3753_v16 = vpop.f32.mrb[66].mxu1 }
 0x549   :  { %v2156_v39 = vmax.f32 %v2036_v31, 0.0  ;;  %v2039_v47 = vadd.f32 %v3753_v16, %v4876_v17  ;;  %v2030_v21 = vpop.f32.mrb[67].mxu1 }
 0x54a   :  { %v2154_v44 = vmax.f32 %v2028_v56, 0.0  ;;  %v2031_v48 = vadd.f32 %v4876_v17, %v2030_v21 }
 0x54b   :  { %v2157_v40 = vmax.f32 %v2039_v47, 0.0  ;;  %v2293_v59 = vadd.f32 %v3800_v9, %v2156_v39 }
 0x54c   :  { %v2155_v12 = vmax.f32 %v2031_v48, 0.0  ;;  %v2291_v35 = vadd.f32 %v2228_v11, %v2154_v44 }
 0x54d   :  { %v2294_v38 = vadd.f32 %v3801_v53, %v2157_v40 }
 0x54e   :  { %v2292_v30 = vadd.f32 %v2231_v32, %v2155_v12  ;;  %v3756_v50 = vpop.f32.mrb[68].mxu1 }
 0x54f   :  { %v2308_v34 = vpack.c.bf16 %v2294_v38, %v2293_v59  ;;  %v2052_v43 = vadd.f32 %v3756_v50, %v4876_v17  ;;  %v2043_v5 = vpop.f32.mrb[69].mxu1 }
 0x550   :  { %v2307_v33 = vpack.c.bf16 %v2292_v30, %v2291_v35  ;;  %v2044_v36 = vadd.f32 %v4876_v17, %v2043_v5  ;;  %v3757_v28 = vpop.f32.mrb[70].mxu1 }
 0x551   :  { %v2160_v41 = vmax.f32 %v2052_v43, 0.0  ;;  %v2055_v14 = vadd.f32 %v3757_v28, %v4876_v17  ;;  %v2046_v61 = vpop.f32.mrb[71].mxu1 }
 0x552   :  { %v2158_v1 = vmax.f32 %v2044_v36, 0.0  ;;  %v2047_v10 = vadd.f32 %v4876_v17, %v2046_v61  ;;  %3830 = vmatprep.mubr.bf16.mxu1 %v2307_v33 }
 0x553   :  { %v2161_v58 = vmax.f32 %v2055_v14, 0.0  ;;  %v2297_v24 = vadd.f32 %v3804_v52, %v2160_v41  ;;  %3831 = vmatmul.mubr.bf16.vlgmr.msra.gmra.mrb[96].mxu1 %v2308_v34 }
 0x554   :  { %v2159_v45 = vmax.f32 %v2047_v10, 0.0  ;;  %v2295_v37 = vadd.f32 %v2244_v3, %v2158_v1 }
 0x555   :  { %v2298_v49 = vadd.f32 %v3805_v27, %v2161_v58 }
 0x556   :  { %v2296_v57 = vadd.f32 %v2247_v54, %v2159_v45  ;;  %v3760_v60 = vpop.f32.mrb[72].mxu1 }
 0x557   :  { %v2310_v29 = vpack.c.bf16 %v2298_v49, %v2297_v24  ;;  %v2068_v25 = vadd.f32 %v3760_v60, %v4876_v17  ;;  %v2059_v23 = vpop.f32.mrb[73].mxu1 }
 0x558   :  { %v2309_v0 = vpack.c.bf16 %v2296_v57, %v2295_v37  ;;  %v2060_v62 = vadd.f32 %v4876_v17, %v2059_v23  ;;  %v3761_v22 = vpop.f32.mrb[74].mxu1 }
 0x559   :  { %v2164_v46 = vmax.f32 %v2068_v25, 0.0  ;;  %v2071_v26 = vadd.f32 %v3761_v22, %v4876_v17  ;;  %v2062_v8 = vpop.f32.mrb[75].mxu1 }
 0x55a   :  { %v2162_v2 = vmax.f32 %v2060_v62, 0.0  ;;  %v2063_v6 = vadd.f32 %v4876_v17, %v2062_v8  ;;  %3834 = vmatprep.mubr.bf16.mxu1 %v2309_v0 }
 0x55b   :  { %v2165_v13 = vmax.f32 %v2071_v26, 0.0  ;;  %v2301_v9 = vadd.f32 %v3808_v63, %v2164_v46  ;;  %3835 = vmatmul.mubr.bf16.gmra.mrb[100].mxu1 %v2310_v29 }
 0x55c   :  { %v2163_v11 = vmax.f32 %v2063_v6, 0.0  ;;  %v2299_v53 = vadd.f32 %v2260_v51, %v2162_v2 }
 0x55d   :  { %v2302_v32 = vadd.f32 %v3809_v7, %v2165_v13 }
 0x55e   :  { %v2300_v52 = vadd.f32 %v2263_v55, %v2163_v11  ;;  %v3764_v3 = vpop.f32.mrb[76].mxu1 }
 0x55f   :  { %v2312_v27 = vpack.c.bf16 %v2302_v32, %v2301_v9  ;;  %v2084_v54 = vadd.f32 %v3764_v3, %v4876_v17  ;;  %v2075_v19 = vpop.f32.mrb[77].mxu1 }
 0x560   :  { %v2311_v31 = vpack.c.bf16 %v2300_v52, %v2299_v53  ;;  %v2076_v4 = vadd.f32 %v4876_v17, %v2075_v19  ;;  %v3765_v56 = vpop.f32.mrb[78].mxu1 }
 0x561   :  { %v2168_v16 = vmax.f32 %v2084_v54, 0.0  ;;  %v2087_v39 = vadd.f32 %v3765_v56, %v4876_v17  ;;  %v2078_v47 = vpop.f32.mrb[79].mxu1 }
 0x562   :  { %v2166_v21 = vmax.f32 %v2076_v4, 0.0  ;;  %v2079_v63 = vadd.f32 %v4876_v17, %v2078_v47  ;;  %3838 = vmatprep.mubr.bf16.mxu1 %v2311_v31 }
 0x563   :  { %v2169_v51 = vmax.f32 %v2087_v39, 0.0  ;;  %v2305_v7 = vadd.f32 %v4865_v42, %v2168_v16  ;;  %3839 = vmatmul.mubr.bf16.gmra.mrb[104].mxu1 %v2312_v27 }
 0x564   :  { %v2167_v55 = vmax.f32 %v2079_v63, 0.0  ;;  %v2303_v44 = vadd.f32 %v4867_v15, %v2166_v21 }
 0x565   :  { %v2306_v48 = vadd.f32 %v4869_v18, %v2169_v51 }
 0x566   :  { %v2304_v40 = vadd.f32 %v4871_v20, %v2167_v55  ;;  %v3768_v59 = vpop.f32.mrb[80].mxu1  ;;  %v4049_v55 = vld [vmem:[#allocation13 + $0x278] sm:$0xff]  }
 0x567   :  { %v2314_v12 = vpack.c.bf16 %v2306_v48, %v2305_v7  ;;  %v2100_v35 = vadd.f32 %v3768_v59, %v4876_v17  ;;  %v2091_v38 = vpop.f32.mrb[81].mxu1  ;;  %v4048_v7 = vld [vmem:[#allocation13 + $0x270] sm:$0xff]   ;;  %v4051_v48 = vld [vmem:[#allocation13 + $0x288] sm:$0xff]  }
 0x568   :  { %v2313_v30 = vpack.c.bf16 %v2304_v40, %v2303_v44  ;;  %v2092_v50 = vadd.f32 %v4876_v17, %v2091_v38  ;;  %v3769_v34 = vpop.f32.mrb[82].mxu1  ;;  %3874 = vmatprep.subr.bf16.mxu0 %v4048_v7  ;;  %v4050_v44 = vld [vmem:[#allocation13 + $0x280] sm:$0xff]   ;;  %v4917_v40 = vld [vmem:[%s5028_s7 + $0x8] ss:$0 sm:$0xff] }
 0x569   :  { %v2103_v43 = vadd.f32 %v3769_v34, %v4876_v17  ;;  %v2094_v42 = vpop.f32.mrb[83].mxu1  ;;  %v2172_v15 = vmax.f32 %v2100_v35, 0.0  ;;  %3875 = vmatpush3.bf16.msra.mxu0 %v4048_v7  ;;  %3910 = vmatprep.subr.bf16.mxu1 %v4050_v44 }
 0x56a   :  { %v2095_v5 = vadd.f32 %v4876_v17, %v2094_v42  ;;  %3842 = vmatprep.mubr.bf16.mxu1 %v2313_v30  ;;  %v2170_v18 = vmax.f32 %v2092_v50, 0.0  ;;  %3876 = vmatprep.subr.bf16.mxu0 %v4049_v55 }
 0x56b   :  { %v2173_v33 = vmax.f32 %v2103_v43, 0.0  ;;  %3843 = vmatmul.mubr.bf16.gmra.mrb[108].mxu1 %v2314_v12 }
 0x56c   :  { %v2171_v20 = vmax.f32 %v2095_v5, 0.0  ;;  %3911 = vmatpush3.bf16.msra.mxu1 %v4050_v44 }
 0x56d   :  { %v2316_v36 = vpack.c.bf16 %v2173_v33, %v2172_v15  ;;  %3877 = vmatpush3.bf16.msra.mxu0 %v4049_v55  ;;  %3912 = vmatprep.subr.bf16.mxu1 %v4051_v48 }
 0x56e   :  { %v2315_v28 = vpack.c.bf16 %v2171_v20, %v2170_v18  ;;  %v3772_v41 = vpop.f32.mrb[84].mxu1 }
 0x56f   :  { %v2116_v14 = vadd.f32 %v3772_v41, %v4876_v17  ;;  %v2107_v61 = vpop.f32.mrb[85].mxu1 }
 0x570   :  { %v2108_v1 = vadd.f32 %v4876_v17, %v2107_v61  ;;  %v3773_v10 = vpop.f32.mrb[86].mxu1  ;;  %3846 = vmatprep.mubr.bf16.mxu1 %v2315_v28  ;;  %3913 = vmatpush3.bf16.msra.mxu1 %v4051_v48 }
 0x571   :  { %v2119_v58 = vadd.f32 %v3773_v10, %v4876_v17  ;;  %v2110_v24 = vpop.f32.mrb[87].mxu1  ;;  %v2176_v37 = vmax.f32 %v2116_v14, 0.0 }
 0x572   :  { %v2111_v45 = vadd.f32 %v4876_v17, %v2110_v24  ;;  %v2174_v57 = vmax.f32 %v2108_v1, 0.0 }
 0x573   :  { %v2177_v49 = vmax.f32 %v2119_v58, 0.0  ;;  %3847 = vmatmul.mubr.bf16.gmra.mrb[112].mxu1 %v2316_v36 }
 0x574   :  { %v2175_v60 = vmax.f32 %v2111_v45, 0.0 }
 0x575   :  { %v2318_v29 = vpack.c.bf16 %v2177_v49, %v2176_v37 }
 0x576   :  { %v2317_v25 = vpack.c.bf16 %v2175_v60, %v2174_v57  ;;  %v3776_v23 = vpop.f32.mrb[88].mxu1 }
 0x577   :  { %v2132_v0 = vadd.f32 %v3776_v23, %v4876_v17  ;;  %v2123_v62 = vpop.f32.mrb[89].mxu1 }
 0x578   :  { %v2124_v22 = vadd.f32 %v4876_v17, %v2123_v62  ;;  %v3777_v46 = vpop.f32.mrb[90].mxu1  ;;  %3850 = vmatprep.mubr.bf16.mxu1 %v2317_v25 }
 0x579   :  { %v2135_v26 = vadd.f32 %v3777_v46, %v4876_v17  ;;  %v2126_v8 = vpop.f32.mrb[91].mxu1  ;;  %v2180_v6 = vmax.f32 %v2132_v0, 0.0 }
 0x57a   :  { %v2127_v2 = vadd.f32 %v4876_v17, %v2126_v8  ;;  %v2178_v9 = vmax.f32 %v2124_v22, 0.0 }
 0x57b   :  { %v2181_v13 = vmax.f32 %v2135_v26, 0.0  ;;  %3851 = vmatmul.mubr.bf16.gmra.mrb[116].mxu1 %v2318_v29 }
 0x57c   :  { %v2179_v11 = vmax.f32 %v2127_v2, 0.0 }
 0x57d   :  { %v2320_v53 = vpack.c.bf16 %v2181_v13, %v2180_v6 }
 0x57e   :  { %v2319_v32 = vpack.c.bf16 %v2179_v11, %v2178_v9  ;;  %v3780_v52 = vpop.f32.mrb[92].mxu1 }
 0x57f   :  { %v2148_v3 = vadd.f32 %v3780_v52, %v4876_v17  ;;  %v2139_v27 = vpop.f32.mrb[93].mxu1 }
 0x580   :  { %v2140_v54 = vadd.f32 %v4876_v17, %v2139_v27  ;;  %v3781_v19 = vpop.f32.mrb[94].mxu1  ;;  %3854 = vmatprep.mubr.bf16.mxu1 %v2319_v32 }
 0x581   :  { %v2151_v31 = vadd.f32 %v3781_v19, %v4876_v17  ;;  %v2142_v4 = vpop.f32.mrb[95].mxu1  ;;  %v2184_v16 = vmax.f32 %v2148_v3, 0.0 }
 0x582   :  { %v2143_v56 = vadd.f32 %v4876_v17, %v2142_v4  ;;  %v2182_v47 = vmax.f32 %v2140_v54, 0.0  ;;  %v4052_v17 = vld [vmem:[#allocation13 + $0x290] sm:$0xff]  }
 0x583   :  { %v2185_v39 = vmax.f32 %v2151_v31, 0.0  ;;  %3855 = vmatmul.mubr.bf16.gmra.mrb[120].mxu1 %v2320_v53  ;;  %3914 = vmatprep.subr.bf16.mxu1 %v4052_v17 }
 0x584   :  { %v2183_v21 = vmax.f32 %v2143_v56, 0.0  ;;  %3915 = vmatpush3.bf16.msra.mxu1 %v4052_v17 }
 0x585   :  { %v2322_v63 = vpack.c.bf16 %v2185_v39, %v2184_v16 }
 0x586   :  { %v2321_v51 = vpack.c.bf16 %v2183_v21, %v2182_v47 }
 0x588   :  { %3858 = vmatprep.mubr.bf16.mxu1 %v2321_v51 }
 0x58b   :  { %3859 = vmatmul.mubr.bf16.gmra.mrb[124].mxu1 %v2322_v63 }
 0x626   :  { %v3832_v59 = vpop.f32.mrb[96].mxu1 }
 0x627   :  { %v2439_v12 = vadd.f32 %v3832_v59, %v4917_v40  ;;  %v2430_v35 = vpop.f32.mrb[97].mxu1 }
 0x628   :  { %v2431_v38 = vadd.f32 %v4917_v40, %v2430_v35  ;;  %v3833_v30 = vpop.f32.mrb[98].mxu1 }
 0x629   :  { %v2442_v50 = vadd.f32 %v3833_v30, %v4917_v40  ;;  %v2433_v34 = vpop.f32.mrb[99].mxu1  ;;  %v2559_v42 = vmax.f32 %v2439_v12, 0.0 }
 0x62a   :  { %v2434_v43 = vadd.f32 %v4917_v40, %v2433_v34  ;;  %v2557_v15 = vmax.f32 %v2431_v38, 0.0 }
 0x62b   :  { %v2560_v5 = vmax.f32 %v2442_v50, 0.0 }
 0x62c   :  { %v2558_v33 = vmax.f32 %v2434_v43, 0.0 }
 0x62d   :  { %v2590_v18 = vpack.c.bf16 %v2560_v5, %v2559_v42 }
 0x62e   :  { %v2589_v20 = vpack.c.bf16 %v2558_v33, %v2557_v15  ;;  %v3836_v36 = vpop.f32.mrb[100].mxu1 }
 0x62f   :  { %v2455_v28 = vadd.f32 %v3836_v36, %v4917_v40  ;;  %v2446_v41 = vpop.f32.mrb[101].mxu1 }
 0x630   :  { %v2447_v14 = vadd.f32 %v4917_v40, %v2446_v41  ;;  %v3837_v61 = vpop.f32.mrb[102].mxu1  ;;  %3878 = vmatprep.mubr.bf16.mxu0 %v2589_v20 }
 0x631   :  { %v2458_v1 = vadd.f32 %v3837_v61, %v4917_v40  ;;  %v2449_v10 = vpop.f32.mrb[103].mxu1  ;;  %3879 = vmatmul.mubr.bf16.vlgmr.msra.gmra.mrb[112].mxu0 %v2590_v18  ;;  %v2563_v24 = vmax.f32 %v2455_v28, 0.0 }
 0x632   :  { %v2450_v58 = vadd.f32 %v4917_v40, %v2449_v10  ;;  %v2561_v37 = vmax.f32 %v2447_v14, 0.0 }
 0x633   :  { %v2564_v45 = vmax.f32 %v2458_v1, 0.0 }
 0x634   :  { %v2562_v49 = vmax.f32 %v2450_v58, 0.0 }
 0x635   :  { %v2592_v57 = vpack.c.bf16 %v2564_v45, %v2563_v24 }
 0x636   :  { %v2591_v60 = vpack.c.bf16 %v2562_v49, %v2561_v37  ;;  %v3840_v29 = vpop.f32.mrb[104].mxu1 }
 0x637   :  { %v2471_v25 = vadd.f32 %v3840_v29, %v4917_v40  ;;  %v2462_v23 = vpop.f32.mrb[105].mxu1 }
 0x638   :  { %v2463_v0 = vadd.f32 %v4917_v40, %v2462_v23  ;;  %v3841_v62 = vpop.f32.mrb[106].mxu1  ;;  %3882 = vmatprep.mubr.bf16.mxu0 %v2591_v60 }
 0x639   :  { %v2474_v22 = vadd.f32 %v3841_v62, %v4917_v40  ;;  %v2465_v46 = vpop.f32.mrb[107].mxu1  ;;  %3883 = vmatmul.mubr.bf16.gmra.mrb[116].mxu0 %v2592_v57  ;;  %v2567_v8 = vmax.f32 %v2471_v25, 0.0 }
 0x63a   :  { %v2466_v26 = vadd.f32 %v4917_v40, %v2465_v46  ;;  %v2565_v6 = vmax.f32 %v2463_v0, 0.0 }
 0x63b   :  { %v2568_v2 = vmax.f32 %v2474_v22, 0.0 }
 0x63c   :  { %v2566_v13 = vmax.f32 %v2466_v26, 0.0 }
 0x63d   :  { %v2594_v9 = vpack.c.bf16 %v2568_v2, %v2567_v8 }
 0x63e   :  { %v2593_v11 = vpack.c.bf16 %v2566_v13, %v2565_v6  ;;  %v3844_v53 = vpop.f32.mrb[108].mxu1 }
 0x63f   :  { %v2487_v32 = vadd.f32 %v3844_v53, %v4917_v40  ;;  %v2478_v52 = vpop.f32.mrb[109].mxu1 }
 0x640   :  { %v2479_v3 = vadd.f32 %v4917_v40, %v2478_v52  ;;  %v3845_v27 = vpop.f32.mrb[110].mxu1  ;;  %3886 = vmatprep.mubr.bf16.mxu0 %v2593_v11 }
 0x641   :  { %v2490_v54 = vadd.f32 %v3845_v27, %v4917_v40  ;;  %v2481_v19 = vpop.f32.mrb[111].mxu1  ;;  %3887 = vmatmul.mubr.bf16.gmra.mrb[120].mxu0 %v2594_v9  ;;  %v2571_v4 = vmax.f32 %v2487_v32, 0.0 }
 0x642   :  { %v2482_v31 = vadd.f32 %v4917_v40, %v2481_v19  ;;  %v2569_v16 = vmax.f32 %v2479_v3, 0.0 }
 0x643   :  { %v2572_v56 = vmax.f32 %v2490_v54, 0.0 }
 0x644   :  { %v2570_v39 = vmax.f32 %v2482_v31, 0.0  ;;  %v4053_v31 = vld [vmem:[#allocation13 + $0x298] sm:$0xff]  }
 0x645   :  { %v2596_v47 = vpack.c.bf16 %v2572_v56, %v2571_v4  ;;  %3916 = vmatprep.subr.bf16.mxu1 %v4053_v31  ;;  %v4054_v4 = vld [vmem:[#allocation13 + $0x2a0] sm:$0xff]   ;;  %v4055_v56 = vld [vmem:[#allocation13 + $0x2a8] sm:$0xff]  }
 0x646   :  { %v2595_v21 = vpack.c.bf16 %v2570_v39, %v2569_v16  ;;  %v3848_v63 = vpop.f32.mrb[112].mxu1  ;;  %3917 = vmatpush3.bf16.msra.mxu1 %v4053_v31  ;;  %v4056_v16 = vld [vmem:[#allocation13 + $0x2b0] sm:$0xff]  }
 0x647   :  { %v2503_v51 = vadd.f32 %v3848_v63, %v4917_v40  ;;  %v2494_v7 = vpop.f32.mrb[113].mxu1  ;;  %3918 = vmatprep.subr.bf16.mxu1 %v4054_v4 }
 0x648   :  { %v2495_v55 = vadd.f32 %v4917_v40, %v2494_v7  ;;  %v3849_v44 = vpop.f32.mrb[114].mxu1  ;;  %3890 = vmatprep.mubr.bf16.mxu0 %v2595_v21 }
 0x649   :  { %v2506_v48 = vadd.f32 %v3849_v44, %v4917_v40  ;;  %v2497_v17 = vpop.f32.mrb[115].mxu1  ;;  %3891 = vmatmul.mubr.bf16.gmra.mrb[124].mxu0 %v2596_v47  ;;  %v2575_v12 = vmax.f32 %v2503_v51, 0.0 }
 0x64a   :  { %v2498_v59 = vadd.f32 %v4917_v40, %v2497_v17  ;;  %v2573_v38 = vmax.f32 %v2495_v55, 0.0  ;;  %3919 = vmatpush3.bf16.msra.mxu1 %v4054_v4 }
 0x64b   :  { %v2576_v35 = vmax.f32 %v2506_v48, 0.0  ;;  %3920 = vmatprep.subr.bf16.mxu1 %v4055_v56 }
 0x64c   :  { %v2574_v30 = vmax.f32 %v2498_v59, 0.0 }
 0x64d   :  { %v2598_v50 = vpack.c.bf16 %v2576_v35, %v2575_v12 }
 0x64e   :  { %v2597_v34 = vpack.c.bf16 %v2574_v30, %v2573_v38  ;;  %v3852_v43 = vpop.f32.mrb[116].mxu1  ;;  %3921 = vmatpush3.bf16.msra.mxu1 %v4055_v56 }
 0x64f   :  { %v2519_v42 = vadd.f32 %v3852_v43, %v4917_v40  ;;  %v2510_v5 = vpop.f32.mrb[117].mxu1  ;;  %3922 = vmatprep.subr.bf16.mxu1 %v4056_v16 }
 0x650   :  { %v2511_v15 = vadd.f32 %v4917_v40, %v2510_v5  ;;  %v3853_v33 = vpop.f32.mrb[118].mxu1  ;;  %3894 = vmatprep.mubr.bf16.mxu0 %v2597_v34  ;;  %v4964_v34 = vld [vmem:[%s5028_s7 + $0x9] ss:$0 sm:$0xff] }
 0x651   :  { %v2522_v18 = vadd.f32 %v3853_v33, %v4917_v40  ;;  %v2513_v20 = vpop.f32.mrb[119].mxu1  ;;  %3895 = vmatmul.mubr.bf16.gmra.mrb[128].mxu0 %v2598_v50  ;;  %v2579_v28 = vmax.f32 %v2519_v42, 0.0 }
 0x652   :  { %v2514_v36 = vadd.f32 %v4917_v40, %v2513_v20  ;;  %v2577_v14 = vmax.f32 %v2511_v15, 0.0  ;;  %3923 = vmatpush3.bf16.msra.mxu1 %v4056_v16 }
 0x653   :  { %v2580_v41 = vmax.f32 %v2522_v18, 0.0 }
 0x654   :  { %v2578_v61 = vmax.f32 %v2514_v36, 0.0 }
 0x655   :  { %v2600_v1 = vpack.c.bf16 %v2580_v41, %v2579_v28 }
 0x656   :  { %v2599_v10 = vpack.c.bf16 %v2578_v61, %v2577_v14  ;;  %v3856_v58 = vpop.f32.mrb[120].mxu1 }
 0x657   :  { %v2535_v24 = vadd.f32 %v3856_v58, %v4917_v40  ;;  %v2526_v45 = vpop.f32.mrb[121].mxu1 }
 0x658   :  { %v2527_v37 = vadd.f32 %v4917_v40, %v2526_v45  ;;  %v3857_v49 = vpop.f32.mrb[122].mxu1  ;;  %3898 = vmatprep.mubr.bf16.mxu0 %v2599_v10 }
 0x659   :  { %v2538_v57 = vadd.f32 %v3857_v49, %v4917_v40  ;;  %v2529_v60 = vpop.f32.mrb[123].mxu1  ;;  %3899 = vmatmul.mubr.bf16.gmra.mrb[132].mxu0 %v2600_v1  ;;  %v2583_v25 = vmax.f32 %v2535_v24, 0.0 }
 0x65a   :  { %v2530_v29 = vadd.f32 %v4917_v40, %v2529_v60  ;;  %v2581_v0 = vmax.f32 %v2527_v37, 0.0 }
 0x65b   :  { %v2584_v23 = vmax.f32 %v2538_v57, 0.0 }
 0x65c   :  { %v2582_v62 = vmax.f32 %v2530_v29, 0.0 }
 0x65d   :  { %v2602_v22 = vpack.c.bf16 %v2584_v23, %v2583_v25 }
 0x65e   :  { %v2601_v46 = vpack.c.bf16 %v2582_v62, %v2581_v0  ;;  %v3860_v26 = vpop.f32.mrb[124].mxu1 }
 0x65f   :  { %v2551_v8 = vadd.f32 %v3860_v26, %v4917_v40  ;;  %v2542_v2 = vpop.f32.mrb[125].mxu1 }
 0x660   :  { %v2543_v6 = vadd.f32 %v4917_v40, %v2542_v2  ;;  %v3861_v13 = vpop.f32.mrb[126].mxu1  ;;  %3902 = vmatprep.mubr.bf16.mxu0 %v2601_v46 }
 0x661   :  { %v2554_v9 = vadd.f32 %v3861_v13, %v4917_v40  ;;  %v2545_v11 = vpop.f32.mrb[127].mxu1  ;;  %3903 = vmatmul.mubr.bf16.gmra.mrb[136].mxu0 %v2602_v22  ;;  %v2587_v32 = vmax.f32 %v2551_v8, 0.0 }
 0x662   :  { %v2546_v53 = vadd.f32 %v4917_v40, %v2545_v11  ;;  %v2585_v3 = vmax.f32 %v2543_v6, 0.0  ;;  %v4057_v40 = vld [vmem:[#allocation13 + $0x2b8] sm:$0xff]  }
 0x663   :  { %v2588_v52 = vmax.f32 %v2554_v9, 0.0  ;;  %3924 = vmatprep.subr.bf16.mxu1 %v4057_v40 }
 0x664   :  { %v2586_v27 = vmax.f32 %v2546_v53, 0.0  ;;  %3925 = vmatpush3.bf16.msra.mxu1 %v4057_v40 }
 0x665   :  { %v2604_v54 = vpack.c.bf16 %v2588_v52, %v2587_v32 }
 0x666   :  { %v2603_v19 = vpack.c.bf16 %v2586_v27, %v2585_v3 }
 0x668   :  { %3906 = vmatprep.mubr.bf16.mxu0 %v2603_v19 }
 0x669   :  { %3907 = vmatmul.mubr.bf16.gmra.mrb[140].mxu0 %v2604_v54 }
 0x704   :  { %v3880_v39 = vpop.f32.mrb[112].mxu0 }
 0x705   :  { %v2712_v47 = vpop.f32.mrb[113].mxu0  ;;  %v2721_v43 = vadd.f32 %v3880_v39, %v4964_v34 }
 0x706   :  { %v3881_v21 = vpop.f32.mrb[114].mxu0  ;;  %v2713_v42 = vadd.f32 %v4964_v34, %v2712_v47 }
 0x707   :  { %v2715_v63 = vpop.f32.mrb[115].mxu0  ;;  %v2724_v15 = vadd.f32 %v3881_v21, %v4964_v34  ;;  %v2841_v41 = vmax.f32 %v2721_v43, 0.0 }
 0x708   :  { %v2716_v20 = vadd.f32 %v4964_v34, %v2715_v63  ;;  %v2839_v10 = vmax.f32 %v2713_v42, 0.0 }
 0x709   :  { %v2842_v45 = vmax.f32 %v2724_v15, 0.0 }
 0x70a   :  { %v2840_v57 = vmax.f32 %v2716_v20, 0.0 }
 0x70c   :  { %v3884_v51 = vpop.f32.mrb[116].mxu0 }
 0x70d   :  { %v2728_v7 = vpop.f32.mrb[117].mxu0  ;;  %v2737_v25 = vadd.f32 %v3884_v51, %v4964_v34 }
 0x70e   :  { %v3885_v55 = vpop.f32.mrb[118].mxu0  ;;  %v2729_v0 = vadd.f32 %v4964_v34, %v2728_v7 }
 0x70f   :  { %v2731_v44 = vpop.f32.mrb[119].mxu0  ;;  %v2740_v46 = vadd.f32 %v3885_v55, %v4964_v34  ;;  %v2845_v53 = vmax.f32 %v2737_v25, 0.0 }
 0x710   :  { %v2732_v6 = vadd.f32 %v4964_v34, %v2731_v44  ;;  %v2843_v27 = vmax.f32 %v2729_v0, 0.0 }
 0x711   :  { %v2846_v31 = vmax.f32 %v2740_v46, 0.0 }
 0x712   :  { %v2844_v16 = vmax.f32 %v2732_v6, 0.0 }
 0x714   :  { %v3888_v48 = vpop.f32.mrb[120].mxu0 }
 0x715   :  { %v2744_v17 = vpop.f32.mrb[121].mxu0  ;;  %v2753_v47 = vadd.f32 %v3888_v48, %v4964_v34 }
 0x716   :  { %v3889_v59 = vpop.f32.mrb[122].mxu0  ;;  %v2745_v63 = vadd.f32 %v4964_v34, %v2744_v17 }
 0x717   :  { %v4951_v12 = vpop.f32.mrb[123].mxu0  ;;  %v2756_v55 = vadd.f32 %v3889_v59, %v4964_v34  ;;  %v2849_v20 = vmax.f32 %v2753_v47, 0.0 }
 0x71c   :  { %v4953_v35 = vpop.f32.mrb[124].mxu0 }
 0x71d   :  { %v4955_v38 = vpop.f32.mrb[125].mxu0 }
 0x71e   :  { %v4957_v30 = vpop.f32.mrb[126].mxu0 }
 0x71f   :  { %v4959_v50 = vpop.f32.mrb[127].mxu0 }
 0x720   :  { %v2764_v0 = vadd.f32 %v4964_v34, %v4959_v50 }
 0x724   :  { %v3896_v5 = vpop.f32.mrb[128].mxu0 }
 0x725   :  { %v2785_v33 = vadd.f32 %v3896_v5, %v4964_v34  ;;  %v2776_v18 = vpop.f32.mrb[129].mxu0  ;;  %v2748_v5 = vadd.f32 %v4964_v34, %v4951_v12 }
 0x726   :  { %v2777_v36 = vadd.f32 %v4964_v34, %v2776_v18  ;;  %v3897_v28 = vpop.f32.mrb[130].mxu0 }
 0x727   :  { %v2857_v14 = vmax.f32 %v2785_v33, 0.0  ;;  %v2788_v61 = vadd.f32 %v3897_v28, %v4964_v34  ;;  %v2779_v1 = vpop.f32.mrb[131].mxu0  ;;  %v2847_v28 = vmax.f32 %v2745_v63, 0.0 }
 0x728   :  { %v2855_v58 = vmax.f32 %v2777_v36, 0.0  ;;  %v2780_v24 = vadd.f32 %v4964_v34, %v2779_v1 }
 0x729   :  { %v2873_v37 = vadd.f32 %v2857_v14, %v2841_v41  ;;  %v2858_v49 = vmax.f32 %v2788_v61, 0.0  ;;  %v2850_v14 = vmax.f32 %v2756_v55, 0.0 }
 0x72a   :  { %v2871_v60 = vadd.f32 %v2855_v58, %v2839_v10  ;;  %v2856_v29 = vmax.f32 %v2780_v24, 0.0  ;;  %v2848_v10 = vmax.f32 %v2748_v5, 0.0  ;;  %v2769_v24 = vadd.f32 %v4953_v35, %v4964_v34 }
 0x72b   :  { %v2874_v23 = vadd.f32 %v2858_v49, %v2842_v45 }
 0x72c   :  { %v2872_v62 = vadd.f32 %v2856_v29, %v2840_v57  ;;  %v3900_v22 = vpop.f32.mrb[132].mxu0  ;;  %v2853_v46 = vmax.f32 %v2769_v24, 0.0 }
 0x72d   :  { %v2888_v26 = vpack.c.bf16 %v2874_v23, %v2873_v37  ;;  %v2801_v8 = vadd.f32 %v3900_v22, %v4964_v34  ;;  %v2792_v2 = vpop.f32.mrb[133].mxu0  ;;  %v2761_v37 = vadd.f32 %v4964_v34, %v4955_v38 }
 0x72e   :  { %v2793_v13 = vadd.f32 %v4964_v34, %v2792_v2  ;;  %v3901_v9 = vpop.f32.mrb[134].mxu0  ;;  %v2887_v11 = vpack.c.bf16 %v2872_v62, %v2871_v60  ;;  %v2772_v60 = vadd.f32 %v4957_v30, %v4964_v34 }
 0x72f   :  { %v2861_v32 = vmax.f32 %v2801_v8, 0.0  ;;  %v2804_v52 = vadd.f32 %v3901_v9, %v4964_v34  ;;  %v2795_v3 = vpop.f32.mrb[135].mxu0  ;;  %v2851_v2 = vmax.f32 %v2761_v37, 0.0 }
 0x730   :  { %v2859_v54 = vmax.f32 %v2793_v13, 0.0  ;;  %v2796_v19 = vadd.f32 %v4964_v34, %v2795_v3  ;;  %3926 = vmatprep.mubr.bf16.mxu1 %v2887_v11  ;;  %v2854_v13 = vmax.f32 %v2772_v60, 0.0 }
 0x731   :  { %v2877_v4 = vadd.f32 %v2861_v32, %v2845_v53  ;;  %v2862_v56 = vmax.f32 %v2804_v52, 0.0  ;;  %3927 = vmatmul.mubr.bf16.vlgmr.msra.gmra.mrb[128].mxu1 %v2888_v26  ;;  %v2852_v53 = vmax.f32 %v2764_v0, 0.0 }
 0x732   :  { %v2875_v40 = vadd.f32 %v2859_v54, %v2843_v27  ;;  %v2860_v39 = vmax.f32 %v2796_v19, 0.0  ;;  %v3213_v19 = vld [vmem:[%s5028_s7 + $0xa] ss:$0 sm:$0xff]  ;;  %s4255_s7 = smov [#allocation14]  }
 0x733   :  { %v2878_v21 = vadd.f32 %v2862_v56, %v2846_v31  ;;  %s3086_s19 = sshll.u32 %s4255_s7, 4  ;;  %s3087_s19 = int_to_ptr.vmem [resolvable:$true] %s3086_s19 }
 0x734   :  { %v2876_v51 = vadd.f32 %v2860_v39, %v2844_v16  ;;  %v3904_v7 = vpop.f32.mrb[136].mxu0  ;;  %s4212_s21 = scalar_lea.vmem %s3087_s19, 2048  ;;  %p4217_p1 = scmp.lt.s32.totalorder %s3087_s19, %s3087_s19 }
 0x735   :  { %v2817_v44 = vadd.f32 %v3904_v7, %v4964_v34  ;;  %v2808_v43 = vpop.f32.mrb[137].mxu0  ;;  %v2890_v42 = vpack.c.bf16 %v2878_v21, %v2877_v4  ;;  %p4213_p0 = scmp.ne.s32.totalorder %s3087_s19, %s4212_s21  ;;  %p4218_p2 = scmp.lt.s32.totalorder %s4212_s21, %s4212_s21 }
 0x736   :  { %v2809_v15 = vadd.f32 %v4964_v34, %v2808_v43  ;;  %v3905_v33 = vpop.f32.mrb[138].mxu0  ;;  %v2889_v18 = vpack.c.bf16 %v2876_v51, %v2875_v40 }
 0x737   :  { %v2865_v48 = vmax.f32 %v2817_v44, 0.0  ;;  %v2820_v36 = vadd.f32 %v3905_v33, %v4964_v34  ;;  %v2811_v17 = vpop.f32.mrb[139].mxu0  ;;  %p4219_p3 = por %p4218_p2, %p4217_p1 }
 0x738   :  { %v2863_v41 = vmax.f32 %v2809_v15, 0.0  ;;  %v2812_v59 = vadd.f32 %v4964_v34, %v2811_v17  ;;  %3930 = vmatprep.mubr.bf16.mxu1 %v2889_v18 }
 0x739   :  { %v2881_v61 = vadd.f32 %v2865_v48, %v2849_v20  ;;  %v2866_v1 = vmax.f32 %v2820_v36, 0.0  ;;  %3931 = vmatmul.mubr.bf16.gmra.mrb[132].mxu1 %v2890_v42  ;;  %p4220_p4 = pnand %p4219_p3, %p4213_p0 }
 0x73a   :  { %v2879_v12 = vadd.f32 %v2863_v41, %v2847_v28  ;;  %v2864_v58 = vmax.f32 %v2812_v59, 0.0 }
 0x73b   :  { %v2882_v45 = vadd.f32 %v2866_v1, %v2850_v14 }
 0x73c   :  { %v2880_v49 = vadd.f32 %v2864_v58, %v2848_v10  ;;  %v3908_v57 = vpop.f32.mrb[140].mxu0 }
 0x73d   :  { %v2833_v29 = vadd.f32 %v3908_v57, %v4964_v34  ;;  %v2824_v25 = vpop.f32.mrb[141].mxu0  ;;  %v2892_v23 = vpack.c.bf16 %v2882_v45, %v2881_v61 }
 0x73e   :  { %v2825_v62 = vadd.f32 %v4964_v34, %v2824_v25  ;;  %v3909_v22 = vpop.f32.mrb[142].mxu0  ;;  %v2891_v35 = vpack.c.bf16 %v2880_v49, %v2879_v12 }
 0x73f   :  { %v2869_v26 = vmax.f32 %v2833_v29, 0.0  ;;  %v2836_v38 = vadd.f32 %v3909_v22, %v4964_v34  ;;  %v2827_v8 = vpop.f32.mrb[143].mxu0 }
 0x740   :  { %v2867_v6 = vmax.f32 %v2825_v62, 0.0  ;;  %v2828_v30 = vadd.f32 %v4964_v34, %v2827_v8  ;;  %3934 = vmatprep.mubr.bf16.mxu1 %v2891_v35 }
 0x741   :  { %v2885_v9 = vadd.f32 %v2869_v26, %v2853_v46  ;;  %v2870_v11 = vmax.f32 %v2836_v38, 0.0  ;;  %3935 = vmatmul.mubr.bf16.gmra.mrb[136].mxu1 %v2892_v23 }
 0x742   :  { %v2883_v50 = vadd.f32 %v2867_v6, %v2851_v2  ;;  %v2868_v32 = vmax.f32 %v2828_v30, 0.0 }
 0x743   :  { %v2886_v52 = vadd.f32 %v2870_v11, %v2854_v13 }
 0x744   :  { %v2884_v3 = vadd.f32 %v2868_v32, %v2852_v53 }
 0x745   :  { %v2894_v27 = vpack.c.bf16 %v2886_v52, %v2885_v9 }
 0x746   :  { %v2893_v54 = vpack.c.bf16 %v2884_v3, %v2883_v50 }
 0x748   :  { %3938 = vmatprep.mubr.bf16.mxu1 %v2893_v54 }
 0x749   :  { %3939 = vmatmul.mubr.bf16.gmra.mrb[140].mxu1 %v2894_v27 }
 0x804   :  { %v3928_v31 = vpop.f32.mrb[128].mxu1 }
 0x805   :  { %v3011_v34 = vadd.f32 %v3928_v31, %v3213_v19  ;;  %v3002_v4 = vpop.f32.mrb[129].mxu1 }
 0x806   :  { %v3003_v56 = vadd.f32 %v3213_v19, %v3002_v4  ;;  %v3929_v16 = vpop.f32.mrb[130].mxu1 }
 0x807   :  { %3067 = vst [vmem:[#allocation14 + $0x10] sm:$0xff] %v3011_v34  ;;  %v3014_v40 = vadd.f32 %v3929_v16, %v3213_v19  ;;  %v3005_v39 = vpop.f32.mrb[131].mxu1 }
 0x808   :  { %3065 = vst [vmem:[#allocation14] sm:$0xff] %v3003_v56  ;;  %v3006_v47 = vadd.f32 %v3213_v19, %v3005_v39 }
 0x809   :  { %3068 = vst [vmem:[#allocation14 + $0x18] sm:$0xff] %v3014_v40 }
 0x80a   :  { %3066 = vst [vmem:[#allocation14 + $0x8] sm:$0xff] %v3006_v47 }
 0x80c   :  { %v3932_v21 = vpop.f32.mrb[132].mxu1 }
 0x80d   :  { %v3027_v63 = vadd.f32 %v3932_v21, %v3213_v19  ;;  %v3018_v51 = vpop.f32.mrb[133].mxu1 }
 0x80e   :  { %v3019_v7 = vadd.f32 %v3213_v19, %v3018_v51  ;;  %v3933_v55 = vpop.f32.mrb[134].mxu1 }
 0x80f   :  { %3071 = vst [vmem:[#allocation14 + $0x30] sm:$0xff] %v3027_v63  ;;  %v3030_v44 = vadd.f32 %v3933_v55, %v3213_v19  ;;  %v3021_v43 = vpop.f32.mrb[135].mxu1 }
 0x810   :  { %3069 = vst [vmem:[#allocation14 + $0x20] sm:$0xff] %v3019_v7  ;;  %v3022_v42 = vadd.f32 %v3213_v19, %v3021_v43 }
 0x811   :  { %3072 = vst [vmem:[#allocation14 + $0x38] sm:$0xff] %v3030_v44 }
 0x812   :  { %3070 = vst [vmem:[#allocation14 + $0x28] sm:$0xff] %v3022_v42 }
 0x814   :  { %v3936_v5 = vpop.f32.mrb[136].mxu1 }
 0x815   :  { %v3043_v15 = vadd.f32 %v3936_v5, %v3213_v19  ;;  %v3034_v33 = vpop.f32.mrb[137].mxu1 }
 0x816   :  { %v3035_v18 = vadd.f32 %v3213_v19, %v3034_v33  ;;  %v3937_v20 = vpop.f32.mrb[138].mxu1 }
 0x817   :  { %3075 = vst [vmem:[#allocation14 + $0x50] sm:$0xff] %v3043_v15  ;;  %v3046_v48 = vadd.f32 %v3937_v20, %v3213_v19  ;;  %v3037_v36 = vpop.f32.mrb[139].mxu1 }
 0x818   :  { %3073 = vst [vmem:[#allocation14 + $0x40] sm:$0xff] %v3035_v18  ;;  %v3038_v17 = vadd.f32 %v3213_v19, %v3037_v36 }
 0x819   :  { %3076 = vst [vmem:[#allocation14 + $0x58] sm:$0xff] %v3046_v48 }
 0x81a   :  { %3074 = vst [vmem:[#allocation14 + $0x48] sm:$0xff] %v3038_v17 }
 0x81c   :  { %v3940_v28 = vpop.f32.mrb[140].mxu1 }
 0x81d   :  { %v3059_v41 = vadd.f32 %v3940_v28, %v3213_v19  ;;  %v3050_v59 = vpop.f32.mrb[141].mxu1 }
 0x81e   :  { %v3051_v14 = vadd.f32 %v3213_v19, %v3050_v59  ;;  %v3941_v61 = vpop.f32.mrb[142].mxu1 }
 0x81f   :  { %3079 = vst [vmem:[#allocation14 + $0x70] sm:$0xff] %v3059_v41  ;;  %v3062_v1 = vadd.f32 %v3941_v61, %v3213_v19  ;;  %v3053_v10 = vpop.f32.mrb[143].mxu1 }
 0x820   :  { %3077 = vst [vmem:[#allocation14 + $0x60] sm:$0xff] %v3051_v14  ;;  %v3054_v12 = vadd.f32 %v3213_v19, %v3053_v10 }
 0x821   :  { %3080 = vst [vmem:[#allocation14 + $0x78] sm:$0xff] %v3062_v1 }
 0x822   :  { %3078 = vst [vmem:[#allocation14 + $0x68] sm:$0xff] %v3054_v12 }
 0x823   :  { %4223 = shalt.err (!%p4220_p4)
}
 0x824   :  { %s4224_s20 = scalar_lea.hbm %s5029_s8, 2048 }
 0x825   :  { %p4225_p5 = scmp.ne.s32.totalorder %s5029_s8, %s4224_s20  ;;  %p4228_p6 = scmp.lt.u32.totalorder %s4224_s20, %s5029_s8 }
 0x827   :  { %p4230_p7 = pnand %p4228_p6, %p4225_p5 }
 0x829   :  { %4233 = shalt.err (!%p4230_p7)
}
 0x82a   :  { %3092 = dma.vmem_to_hbm [thread:$0]  %s3087_s19, 2048, %s5029_s8, [#allocation4], %s4249_s28, %s4249_s28, %s4250_s9  }
 0x82b   :  { %4242 = dma.done.wait [#allocation4], 2048  }
 0x82c   :  { %4243 = vsyncadd [#allocation4], 4294965248 }
 0x82d   :  { %3096 = vsyncpa [#allocation3], 1 }
 0x82e   :  { %3097 = vsyncpa [#allocation6], 1 }
 0x82f   :  { %3098 = vsyncpa [#allocation9], 1 }
 0x830   :  { %3099 = vsyncpa [#allocation12], 1 }
 0x831   :  { %3100 = vsyncpa [#allocation4], 1 }

</bundles_post_ra>
